<compile_context>
chip_gen: v7x
topology: tpu7x:2x2x1
jax: 0.10.0
libtpu: 0.0.40
codegen_flags: <defaults>
</compile_context>

<pallas_src>
import jax
import jax.numpy as jnp
from jax import lax
from jax.experimental import pallas as pl
from jax.experimental.pallas import tpu as pltpu


def _round_up(x, m):
    return (x + m - 1) // m * m


def _pick_channel_tile(C, plane_bytes, budget_bytes):
    """Largest divisor of C whose double-buffered input block fits the budget."""
    ct = max(1, min(C, budget_bytes // max(1, 2 * plane_bytes)))
    while C % ct:
        ct -= 1
    return ct


def spatial_attention_pallas(x, w, *, channel_tile=None,
                             input_block_budget_bytes=16 * 1024 * 1024):
    """x: (N, C, H, W); w: (K, K) weight of Conv2d(1, 1, K, bias=False)."""
    N, C, H, W = x.shape
    K = int(w.shape[-1])
    R = (K - 1) // 2

    isz = jnp.dtype(x.dtype).itemsize
    sub = {4: 8, 2: 16, 1: 32}.get(isz, 8)           # sublane packing granularity
    # Layout-padded VMEM footprint of one (H, W) plane (nothing padded in HBM).
    plane_bytes = _round_up(H, sub) * _round_up(W, 128) * isz

    CT = (_pick_channel_tile(C, plane_bytes, input_block_budget_bytes)
          if channel_tile is None else channel_tile)
    assert C % CT == 0, "channel_tile must divide C"
    n_steps = C // CT

    # Zero-haloed conv plane: data at [0:H, 0:W].  Roll wrap-around only ever
    # touches the zero halo as long as HpH >= H + R and Wp >= W + R.
    HpH = _round_up(H + R, 8)
    Wp = _round_up(W + R, 128)

    w_flat = w.astype(jnp.float32).reshape(K * K)

    def kernel(w_ref, x_ref, o_ref, m_ref):
        # w_ref : (K*K,) f32 in SMEM      conv taps (scalar reads)
        # x_ref : (CT, H, W)              channel block of one image
        # o_ref : (H, W)                  sigmoid(conv(max_c x)) for this image
        # m_ref : (HpH, Wp) f32 VMEM      zero-haloed running channel max

        # ---- channel max of this block (streamed per channel, no big live value)
        m0 = x_ref[0]
        if CT <= 8:
            for i in range(1, CT):                   # unrolled, LLO-visible
                m0 = jnp.maximum(m0, x_ref[i])
        elif CT > 1:
            m0 = lax.fori_loop(1, CT,
                               lambda i, m: jnp.maximum(m, x_ref[i]), m0)
        blk = m0.astype(jnp.float32)                 # (H, W)

        def _conv_store():
            plane = m_ref[...]                       # (HpH, Wp); halo is zero
            taps = [w_ref[t] for t in range(K * K)]  # hoisted scalar SMEM reads
            acc = plane * taps[R * K + R]            # di = dj = 0 tap
            for dj in range(-R, R + 1):              # lane rolls: outer (K-1)
                cs = plane if dj == 0 else pltpu.roll(plane, (-dj) % Wp, 1)
                for di in range(-R, R + 1):          # sublane rolls: inner
                    if di == 0 and dj == 0:
                        continue
                    rs = cs if di == 0 else pltpu.roll(cs, (-di) % HpH, 0)
                    acc = acc + rs * taps[(di + R) * K + (dj + R)]
            o_ref[...] = jax.nn.sigmoid(acc[0:H, 0:W]).astype(o_ref.dtype)

        if n_steps == 1:
            # Fast path: single channel step — no pl.when branching.
            m_ref[...] = jnp.zeros_like(m_ref)       # establish the zero halo
            m_ref[0:H, 0:W] = blk
            _conv_store()
        else:
            c = pl.program_id(1)

            @pl.when(c == 0)
            def _():
                m_ref[...] = jnp.zeros_like(m_ref)   # re-establish the zero halo
                m_ref[0:H, 0:W] = blk

            @pl.when(c != 0)
            def _():
                m_ref[0:H, 0:W] = jnp.maximum(m_ref[0:H, 0:W], blk)

            @pl.when(c == n_steps - 1)
            def _():
                _conv_store()

    # ---- VMEM budget: actual footprint, clamped under v7x's 64 MiB ----------
    out_plane_bytes = _round_up(H, sub) * _round_up(W, 128) * isz
    needed = (2 * CT * plane_bytes          # double-buffered input block
              + 2 * out_plane_bytes         # output block
              + HpH * Wp * 4)               # channel-max scratch
    vmem_limit = min(max(needed + (4 << 20), 32 << 20), 48 << 20)
    vmem_limit = max(vmem_limit, needed + (1 << 20))   # never under-provision

    out = pl.pallas_call(
        kernel,
        out_shape=jax.ShapeDtypeStruct((N, 1, H, W), x.dtype),
        grid=(N, n_steps),
        in_specs=[
            pl.BlockSpec(memory_space=pltpu.MemorySpace.SMEM),          # taps
            pl.BlockSpec((None, CT, H, W), lambda n, c: (n, c, 0, 0)),  # x
        ],
        out_specs=pl.BlockSpec((None, None, H, W), lambda n, c: (n, 0, 0, 0)),
        scratch_shapes=[pltpu.VMEM((HpH, Wp), jnp.float32)],
        compiler_params=pltpu.CompilerParams(
            dimension_semantics=("parallel", "arbitrary"),
            vmem_limit_bytes=int(vmem_limit)),
    )(w_flat, x)

    return out


def spatial_attention_ref(x, w):
    """Pure-JAX reference (matches PyTorch semantics)."""
    m = jnp.max(x, axis=1, keepdims=True)                    # (N,1,H,W)
    K = w.shape[-1]
    pad = (K - 1) // 2
    y = lax.conv_general_dilated(
        m, w.reshape(1, 1, K, K),
        window_strides=(1, 1), padding=[(pad, pad), (pad, pad)],
        dimension_numbers=("NCHW", "OIHW", "NCHW"))
    return jax.nn.sigmoid(y)


if __name__ == "__main__":
    # Deterministic parameter init (Conv2d(1,1,7,7,bias=False) weight).
    kernel_size = 7
    key = jax.random.PRNGKey(0)
    kx, kw = jax.random.split(key)

    x = jax.random.normal(kx, (2, 4, 16, 16), dtype=jnp.float32)
    w = (jax.random.normal(kw, (kernel_size, kernel_size), dtype=jnp.float32)
         * (1.0 / kernel_size))

    ref = spatial_attention_ref(x, w)

    # channel_tile=2 exercises the running channel-max accumulation path
    # (grid = (2 images, 2 channel steps)).
    out = jax.block_until_ready(spatial_attention_pallas(x, w, channel_tile=2))
    assert out.shape == (2, 1, 16, 16), out.shape
    assert jnp.allclose(out, ref, atol=1e-5, rtol=1e-5), \
        float(jnp.max(jnp.abs(out - ref)))

    # Default tiling (CT == C) takes the single-step fast path.
    out2 = jax.block_until_ready(spatial_attention_pallas(x, w))
    assert jnp.allclose(out2, ref, atol=1e-5, rtol=1e-5), \
        float(jnp.max(jnp.abs(out2 - ref)))

    print("KERNEL_OK")
</pallas_src>

<mosaic_0001>
module attributes {stable_mosaic.version = 11 : i64} {
  func.func @kernel(%arg0: i32, %arg1: i32, %arg2: memref<49xf32, #tpu.memory_space<smem>>, %arg3: memref<1x2x16x16xf32, #tpu.memory_space<vmem>>, %arg4: memref<1x1x16x16xf32, #tpu.memory_space<vmem>>, %arg5: memref<24x128xf32, #tpu.memory_space<vmem>>) attributes {dimension_semantics = [#tpu.dimension_semantics<parallel>, #tpu.dimension_semantics<arbitrary>], iteration_bounds = array<i64: 2, 2>, scalar_prefetch = 0 : i64, scratch_operands = 1 : i64, tpu.core_type = #tpu.core_type<tc>, window_params = [{transform_indices = @transform_0, window_bounds = array<i64: 49>}, {transform_indices = @transform_1, window_bounds = array<i64: 1, 2, 16, 16>}, {transform_indices = @transform_2, window_bounds = array<i64: 1, 1, 16, 16>}]} {
    %c0 = arith.constant 0 : index
    %c0_0 = arith.constant 0 : index
    %c0_1 = arith.constant 0 : index
    %c0_2 = arith.constant 0 : index
    %0 = vector.load %arg3[%c0, %c0_0, %c0_1, %c0_2] : memref<1x2x16x16xf32, #tpu.memory_space<vmem>>, vector<1x1x16x16xf32>
    %1 = vector.shape_cast %0 : vector<1x1x16x16xf32> to vector<16x16xf32>
    %c0_3 = arith.constant 0 : index
    %c1 = arith.constant 1 : index
    %c0_4 = arith.constant 0 : index
    %c0_5 = arith.constant 0 : index
    %2 = vector.load %arg3[%c0_3, %c1, %c0_4, %c0_5] : memref<1x2x16x16xf32, #tpu.memory_space<vmem>>, vector<1x1x16x16xf32>
    %3 = vector.shape_cast %2 : vector<1x1x16x16xf32> to vector<16x16xf32>
    %4 = arith.maximumf %1, %3 : vector<16x16xf32>
    %c0_i32 = arith.constant 0 : i32
    %5 = arith.cmpi eq, %arg1, %c0_i32 : i32
    %6 = arith.extui %5 : i1 to i32
    %c0_i32_6 = arith.constant 0 : i32
    %7 = arith.cmpi ne, %6, %c0_i32_6 : i32
    scf.if %7 {
      %cst = arith.constant 0.000000e+00 : f32
      %14 = vector.broadcast %cst : f32 to vector<24x128xf32>
      %c0_10 = arith.constant 0 : index
      %c0_11 = arith.constant 0 : index
      %15 = vector.load %arg5[%c0_10, %c0_11] : memref<24x128xf32, #tpu.memory_space<vmem>>, vector<24x128xf32>
      tpu.vector_store %arg5[%c0_10, %c0_11], %14 {strides = array<i32>} : memref<24x128xf32, #tpu.memory_space<vmem>>, vector<24x128xf32>,
      %c0_12 = arith.constant 0 : index
      %c0_13 = arith.constant 0 : index
      %16 = vector.load %arg5[%c0_12, %c0_13] : memref<24x128xf32, #tpu.memory_space<vmem>>, vector<16x16xf32>
      tpu.vector_store %arg5[%c0_12, %c0_13], %4 {strides = array<i32>} : memref<24x128xf32, #tpu.memory_space<vmem>>, vector<16x16xf32>,
    } else {
    }
    %c0_i32_7 = arith.constant 0 : i32
    %8 = arith.cmpi ne, %arg1, %c0_i32_7 : i32
    %9 = arith.extui %8 : i1 to i32
    %c0_i32_8 = arith.constant 0 : i32
    %10 = arith.cmpi ne, %9, %c0_i32_8 : i32
    scf.if %10 {
      %c0_10 = arith.constant 0 : index
      %c0_11 = arith.constant 0 : index
      %14 = vector.load %arg5[%c0_10, %c0_11] : memref<24x128xf32, #tpu.memory_space<vmem>>, vector<16x16xf32>
      %15 = arith.maximumf %14, %4 : vector<16x16xf32>
      %c0_12 = arith.constant 0 : index
      %c0_13 = arith.constant 0 : index
      %16 = vector.load %arg5[%c0_12, %c0_13] : memref<24x128xf32, #tpu.memory_space<vmem>>, vector<16x16xf32>
      tpu.vector_store %arg5[%c0_12, %c0_13], %15 {strides = array<i32>} : memref<24x128xf32, #tpu.memory_space<vmem>>, vector<16x16xf32>,
    } else {
    }
    %c1_i32 = arith.constant 1 : i32
    %11 = arith.cmpi eq, %arg1, %c1_i32 : i32
    %12 = arith.extui %11 : i1 to i32
    %c0_i32_9 = arith.constant 0 : i32
    %13 = arith.cmpi ne, %12, %c0_i32_9 : i32
    scf.if %13 {
      %c0_10 = arith.constant 0 : index
      %c0_11 = arith.constant 0 : index
      %14 = vector.load %arg5[%c0_10, %c0_11] : memref<24x128xf32, #tpu.memory_space<vmem>>, vector<24x128xf32>
      %c0_12 = arith.constant 0 : index
      %15 = memref.load %arg2[%c0_12] : memref<49xf32, #tpu.memory_space<smem>>
      %c1_13 = arith.constant 1 : index
      %16 = memref.load %arg2[%c1_13] : memref<49xf32, #tpu.memory_space<smem>>
      %c2 = arith.constant 2 : index
      %17 = memref.load %arg2[%c2] : memref<49xf32, #tpu.memory_space<smem>>
      %c3 = arith.constant 3 : index
      %18 = memref.load %arg2[%c3] : memref<49xf32, #tpu.memory_space<smem>>
      %c4 = arith.constant 4 : index
      %19 = memref.load %arg2[%c4] : memref<49xf32, #tpu.memory_space<smem>>
      %c5 = arith.constant 5 : index
      %20 = memref.load %arg2[%c5] : memref<49xf32, #tpu.memory_space<smem>>
      %c6 = arith.constant 6 : index
      %21 = memref.load %arg2[%c6] : memref<49xf32, #tpu.memory_space<smem>>
      %c7 = arith.constant 7 : index
      %22 = memref.load %arg2[%c7] : memref<49xf32, #tpu.memory_space<smem>>
      %c8 = arith.constant 8 : index
      %23 = memref.load %arg2[%c8] : memref<49xf32, #tpu.memory_space<smem>>
      %c9 = arith.constant 9 : index
      %24 = memref.load %arg2[%c9] : memref<49xf32, #tpu.memory_space<smem>>
      %c10 = arith.constant 10 : index
      %25 = memref.load %arg2[%c10] : memref<49xf32, #tpu.memory_space<smem>>
      %c11 = arith.constant 11 : index
      %26 = memref.load %arg2[%c11] : memref<49xf32, #tpu.memory_space<smem>>
      %c12 = arith.constant 12 : index
      %27 = memref.load %arg2[%c12] : memref<49xf32, #tpu.memory_space<smem>>
      %c13 = arith.constant 13 : index
      %28 = memref.load %arg2[%c13] : memref<49xf32, #tpu.memory_space<smem>>
      %c14 = arith.constant 14 : index
      %29 = memref.load %arg2[%c14] : memref<49xf32, #tpu.memory_space<smem>>
      %c15 = arith.constant 15 : index
      %30 = memref.load %arg2[%c15] : memref<49xf32, #tpu.memory_space<smem>>
      %c16 = arith.constant 16 : index
      %31 = memref.load %arg2[%c16] : memref<49xf32, #tpu.memory_space<smem>>
      %c17 = arith.constant 17 : index
      %32 = memref.load %arg2[%c17] : memref<49xf32, #tpu.memory_space<smem>>
      %c18 = arith.constant 18 : index
      %33 = memref.load %arg2[%c18] : memref<49xf32, #tpu.memory_space<smem>>
      %c19 = arith.constant 19 : index
      %34 = memref.load %arg2[%c19] : memref<49xf32, #tpu.memory_space<smem>>
      %c20 = arith.constant 20 : index
      %35 = memref.load %arg2[%c20] : memref<49xf32, #tpu.memory_space<smem>>
      %c21 = arith.constant 21 : index
      %36 = memref.load %arg2[%c21] : memref<49xf32, #tpu.memory_space<smem>>
      %c22 = arith.constant 22 : index
      %37 = memref.load %arg2[%c22] : memref<49xf32, #tpu.memory_space<smem>>
      %c23 = arith.constant 23 : index
      %38 = memref.load %arg2[%c23] : memref<49xf32, #tpu.memory_space<smem>>
      %c24 = arith.constant 24 : index
      %39 = memref.load %arg2[%c24] : memref<49xf32, #tpu.memory_space<smem>>
      %c25 = arith.constant 25 : index
      %40 = memref.load %arg2[%c25] : memref<49xf32, #tpu.memory_space<smem>>
      %c26 = arith.constant 26 : index
      %41 = memref.load %arg2[%c26] : memref<49xf32, #tpu.memory_space<smem>>
      %c27 = arith.constant 27 : index
      %42 = memref.load %arg2[%c27] : memref<49xf32, #tpu.memory_space<smem>>
      %c28 = arith.constant 28 : index
      %43 = memref.load %arg2[%c28] : memref<49xf32, #tpu.memory_space<smem>>
      %c29 = arith.constant 29 : index
      %44 = memref.load %arg2[%c29] : memref<49xf32, #tpu.memory_space<smem>>
      %c30 = arith.constant 30 : index
      %45 = memref.load %arg2[%c30] : memref<49xf32, #tpu.memory_space<smem>>
      %c31 = arith.constant 31 : index
      %46 = memref.load %arg2[%c31] : memref<49xf32, #tpu.memory_space<smem>>
      %c32 = arith.constant 32 : index
      %47 = memref.load %arg2[%c32] : memref<49xf32, #tpu.memory_space<smem>>
      %c33 = arith.constant 33 : index
      %48 = memref.load %arg2[%c33] : memref<49xf32, #tpu.memory_space<smem>>
      %c34 = arith.constant 34 : index
      %49 = memref.load %arg2[%c34] : memref<49xf32, #tpu.memory_space<smem>>
      %c35 = arith.constant 35 : index
      %50 = memref.load %arg2[%c35] : memref<49xf32, #tpu.memory_space<smem>>
      %c36 = arith.constant 36 : index
      %51 = memref.load %arg2[%c36] : memref<49xf32, #tpu.memory_space<smem>>
      %c37 = arith.constant 37 : index
      %52 = memref.load %arg2[%c37] : memref<49xf32, #tpu.memory_space<smem>>
      %c38 = arith.constant 38 : index
      %53 = memref.load %arg2[%c38] : memref<49xf32, #tpu.memory_space<smem>>
      %c39 = arith.constant 39 : index
      %54 = memref.load %arg2[%c39] : memref<49xf32, #tpu.memory_space<smem>>
      %c40 = arith.constant 40 : index
      %55 = memref.load %arg2[%c40] : memref<49xf32, #tpu.memory_space<smem>>
      %c41 = arith.constant 41 : index
      %56 = memref.load %arg2[%c41] : memref<49xf32, #tpu.memory_space<smem>>
      %c42 = arith.constant 42 : index
      %57 = memref.load %arg2[%c42] : memref<49xf32, #tpu.memory_space<smem>>
      %c43 = arith.constant 43 : index
      %58 = memref.load %arg2[%c43] : memref<49xf32, #tpu.memory_space<smem>>
      %c44 = arith.constant 44 : index
      %59 = memref.load %arg2[%c44] : memref<49xf32, #tpu.memory_space<smem>>
      %c45 = arith.constant 45 : index
      %60 = memref.load %arg2[%c45] : memref<49xf32, #tpu.memory_space<smem>>
      %c46 = arith.constant 46 : index
      %61 = memref.load %arg2[%c46] : memref<49xf32, #tpu.memory_space<smem>>
      %c47 = arith.constant 47 : index
      %62 = memref.load %arg2[%c47] : memref<49xf32, #tpu.memory_space<smem>>
      %c48 = arith.constant 48 : index
      %63 = memref.load %arg2[%c48] : memref<49xf32, #tpu.memory_space<smem>>
      %64 = vector.broadcast %39 : f32 to vector<24x128xf32>
      %65 = arith.mulf %14, %64 : vector<24x128xf32>
      %c3_i32 = arith.constant 3 : i32
      %66 = tpu.dynamic_rotate %14 by %c3_i32 dim 1 : vector<24x128xf32>, i32 -> vector<24x128xf32>
      %c3_i32_14 = arith.constant 3 : i32
      %67 = tpu.dynamic_rotate %66 by %c3_i32_14 dim 0 : vector<24x128xf32>, i32 -> vector<24x128xf32>
      %68 = vector.broadcast %15 : f32 to vector<24x128xf32>
      %69 = arith.mulf %67, %68 : vector<24x128xf32>
      %70 = arith.addf %65, %69 : vector<24x128xf32>
      %c2_i32 = arith.constant 2 : i32
      %71 = tpu.dynamic_rotate %66 by %c2_i32 dim 0 : vector<24x128xf32>, i32 -> vector<24x128xf32>
      %72 = vector.broadcast %22 : f32 to vector<24x128xf32>
      %73 = arith.mulf %71, %72 : vector<24x128xf32>
      %74 = arith.addf %70, %73 : vector<24x128xf32>
      %c1_i32_15 = arith.constant 1 : i32
      %75 = tpu.dynamic_rotate %66 by %c1_i32_15 dim 0 : vector<24x128xf32>, i32 -> vector<24x128xf32>
      %76 = vector.broadcast %29 : f32 to vector<24x128xf32>
      %77 = arith.mulf %75, %76 : vector<24x128xf32>
      %78 = arith.addf %74, %77 : vector<24x128xf32>
      %79 = vector.broadcast %36 : f32 to vector<24x128xf32>
      %80 = arith.mulf %66, %79 : vector<24x128xf32>
      %81 = arith.addf %78, %80 : vector<24x128xf32>
      %c23_i32 = arith.constant 23 : i32
      %82 = tpu.dynamic_rotate %66 by %c23_i32 dim 0 : vector<24x128xf32>, i32 -> vector<24x128xf32>
      %83 = vector.broadcast %43 : f32 to vector<24x128xf32>
      %84 = arith.mulf %82, %83 : vector<24x128xf32>
      %85 = arith.addf %81, %84 : vector<24x128xf32>
      %c22_i32 = arith.constant 22 : i32
      %86 = tpu.dynamic_rotate %66 by %c22_i32 dim 0 : vector<24x128xf32>, i32 -> vector<24x128xf32>
      %87 = vector.broadcast %50 : f32 to vector<24x128xf32>
      %88 = arith.mulf %86, %87 : vector<24x128xf32>
      %89 = arith.addf %85, %88 : vector<24x128xf32>
      %c21_i32 = arith.constant 21 : i32
      %90 = tpu.dynamic_rotate %66 by %c21_i32 dim 0 : vector<24x128xf32>, i32 -> vector<24x128xf32>
      %91 = vector.broadcast %57 : f32 to vector<24x128xf32>
      %92 = arith.mulf %90, %91 : vector<24x128xf32>
      %93 = arith.addf %89, %92 : vector<24x128xf32>
      %c2_i32_16 = arith.constant 2 : i32
      %94 = tpu.dynamic_rotate %14 by %c2_i32_16 dim 1 : vector<24x128xf32>, i32 -> vector<24x128xf32>
      %c3_i32_17 = arith.constant 3 : i32
      %95 = tpu.dynamic_rotate %94 by %c3_i32_17 dim 0 : vector<24x128xf32>, i32 -> vector<24x128xf32>
      %96 = vector.broadcast %16 : f32 to vector<24x128xf32>
      %97 = arith.mulf %95, %96 : vector<24x128xf32>
      %98 = arith.addf %93, %97 : vector<24x128xf32>
      %c2_i32_18 = arith.constant 2 : i32
      %99 = tpu.dynamic_rotate %94 by %c2_i32_18 dim 0 : vector<24x128xf32>, i32 -> vector<24x128xf32>
      %100 = vector.broadcast %23 : f32 to vector<24x128xf32>
      %101 = arith.mulf %99, %100 : vector<24x128xf32>
      %102 = arith.addf %98, %101 : vector<24x128xf32>
      %c1_i32_19 = arith.constant 1 : i32
      %103 = tpu.dynamic_rotate %94 by %c1_i32_19 dim 0 : vector<24x128xf32>, i32 -> vector<24x128xf32>
      %104 = vector.broadcast %30 : f32 to vector<24x128xf32>
      %105 = arith.mulf %103, %104 : vector<24x128xf32>
      %106 = arith.addf %102, %105 : vector<24x128xf32>
      %107 = vector.broadcast %37 : f32 to vector<24x128xf32>
      %108 = arith.mulf %94, %107 : vector<24x128xf32>
      %109 = arith.addf %106, %108 : vector<24x128xf32>
      %c23_i32_20 = arith.constant 23 : i32
      %110 = tpu.dynamic_rotate %94 by %c23_i32_20 dim 0 : vector<24x128xf32>, i32 -> vector<24x128xf32>
      %111 = vector.broadcast %44 : f32 to vector<24x128xf32>
      %112 = arith.mulf %110, %111 : vector<24x128xf32>
      %113 = arith.addf %109, %112 : vector<24x128xf32>
      %c22_i32_21 = arith.constant 22 : i32
      %114 = tpu.dynamic_rotate %94 by %c22_i32_21 dim 0 : vector<24x128xf32>, i32 -> vector<24x128xf32>
      %115 = vector.broadcast %51 : f32 to vector<24x128xf32>
      %116 = arith.mulf %114, %115 : vector<24x128xf32>
      %117 = arith.addf %113, %116 : vector<24x128xf32>
      %c21_i32_22 = arith.constant 21 : i32
      %118 = tpu.dynamic_rotate %94 by %c21_i32_22 dim 0 : vector<24x128xf32>, i32 -> vector<24x128xf32>
      %119 = vector.broadcast %58 : f32 to vector<24x128xf32>
      %120 = arith.mulf %118, %119 : vector<24x128xf32>
      %121 = arith.addf %117, %120 : vector<24x128xf32>
      %c1_i32_23 = arith.constant 1 : i32
      %122 = tpu.dynamic_rotate %14 by %c1_i32_23 dim 1 : vector<24x128xf32>, i32 -> vector<24x128xf32>
      %c3_i32_24 = arith.constant 3 : i32
      %123 = tpu.dynamic_rotate %122 by %c3_i32_24 dim 0 : vector<24x128xf32>, i32 -> vector<24x128xf32>
      %124 = vector.broadcast %17 : f32 to vector<24x128xf32>
      %125 = arith.mulf %123, %124 : vector<24x128xf32>
      %126 = arith.addf %121, %125 : vector<24x128xf32>
      %c2_i32_25 = arith.constant 2 : i32
      %127 = tpu.dynamic_rotate %122 by %c2_i32_25 dim 0 : vector<24x128xf32>, i32 -> vector<24x128xf32>
      %128 = vector.broadcast %24 : f32 to vector<24x128xf32>
      %129 = arith.mulf %127, %128 : vector<24x128xf32>
      %130 = arith.addf %126, %129 : vector<24x128xf32>
      %c1_i32_26 = arith.constant 1 : i32
      %131 = tpu.dynamic_rotate %122 by %c1_i32_26 dim 0 : vector<24x128xf32>, i32 -> vector<24x128xf32>
      %132 = vector.broadcast %31 : f32 to vector<24x128xf32>
      %133 = arith.mulf %131, %132 : vector<24x128xf32>
      %134 = arith.addf %130, %133 : vector<24x128xf32>
      %135 = vector.broadcast %38 : f32 to vector<24x128xf32>
      %136 = arith.mulf %122, %135 : vector<24x128xf32>
      %137 = arith.addf %134, %136 : vector<24x128xf32>
      %c23_i32_27 = arith.constant 23 : i32
      %138 = tpu.dynamic_rotate %122 by %c23_i32_27 dim 0 : vector<24x128xf32>, i32 -> vector<24x128xf32>
      %139 = vector.broadcast %45 : f32 to vector<24x128xf32>
      %140 = arith.mulf %138, %139 : vector<24x128xf32>
      %141 = arith.addf %137, %140 : vector<24x128xf32>
      %c22_i32_28 = arith.constant 22 : i32
      %142 = tpu.dynamic_rotate %122 by %c22_i32_28 dim 0 : vector<24x128xf32>, i32 -> vector<24x128xf32>
      %143 = vector.broadcast %52 : f32 to vector<24x128xf32>
      %144 = arith.mulf %142, %143 : vector<24x128xf32>
      %145 = arith.addf %141, %144 : vector<24x128xf32>
      %c21_i32_29 = arith.constant 21 : i32
      %146 = tpu.dynamic_rotate %122 by %c21_i32_29 dim 0 : vector<24x128xf32>, i32 -> vector<24x128xf32>
      %147 = vector.broadcast %59 : f32 to vector<24x128xf32>
      %148 = arith.mulf %146, %147 : vector<24x128xf32>
      %149 = arith.addf %145, %148 : vector<24x128xf32>
      %c3_i32_30 = arith.constant 3 : i32
      %150 = tpu.dynamic_rotate %14 by %c3_i32_30 dim 0 : vector<24x128xf32>, i32 -> vector<24x128xf32>
      %151 = vector.broadcast %18 : f32 to vector<24x128xf32>
      %152 = arith.mulf %150, %151 : vector<24x128xf32>
      %153 = arith.addf %149, %152 : vector<24x128xf32>
      %c2_i32_31 = arith.constant 2 : i32
      %154 = tpu.dynamic_rotate %14 by %c2_i32_31 dim 0 : vector<24x128xf32>, i32 -> vector<24x128xf32>
      %155 = vector.broadcast %25 : f32 to vector<24x128xf32>
      %156 = arith.mulf %154, %155 : vector<24x128xf32>
      %157 = arith.addf %153, %156 : vector<24x128xf32>
      %c1_i32_32 = arith.constant 1 : i32
      %158 = tpu.dynamic_rotate %14 by %c1_i32_32 dim 0 : vector<24x128xf32>, i32 -> vector<24x128xf32>
      %159 = vector.broadcast %32 : f32 to vector<24x128xf32>
      %160 = arith.mulf %158, %159 : vector<24x128xf32>
      %161 = arith.addf %157, %160 : vector<24x128xf32>
      %c23_i32_33 = arith.constant 23 : i32
      %162 = tpu.dynamic_rotate %14 by %c23_i32_33 dim 0 : vector<24x128xf32>, i32 -> vector<24x128xf32>
      %163 = vector.broadcast %46 : f32 to vector<24x128xf32>
      %164 = arith.mulf %162, %163 : vector<24x128xf32>
      %165 = arith.addf %161, %164 : vector<24x128xf32>
      %c22_i32_34 = arith.constant 22 : i32
      %166 = tpu.dynamic_rotate %14 by %c22_i32_34 dim 0 : vector<24x128xf32>, i32 -> vector<24x128xf32>
      %167 = vector.broadcast %53 : f32 to vector<24x128xf32>
      %168 = arith.mulf %166, %167 : vector<24x128xf32>
      %169 = arith.addf %165, %168 : vector<24x128xf32>
      %c21_i32_35 = arith.constant 21 : i32
      %170 = tpu.dynamic_rotate %14 by %c21_i32_35 dim 0 : vector<24x128xf32>, i32 -> vector<24x128xf32>
      %171 = vector.broadcast %60 : f32 to vector<24x128xf32>
      %172 = arith.mulf %170, %171 : vector<24x128xf32>
      %173 = arith.addf %169, %172 : vector<24x128xf32>
      %c127_i32 = arith.constant 127 : i32
      %174 = tpu.dynamic_rotate %14 by %c127_i32 dim 1 : vector<24x128xf32>, i32 -> vector<24x128xf32>
      %c3_i32_36 = arith.constant 3 : i32
      %175 = tpu.dynamic_rotate %174 by %c3_i32_36 dim 0 : vector<24x128xf32>, i32 -> vector<24x128xf32>
      %176 = vector.broadcast %19 : f32 to vector<24x128xf32>
      %177 = arith.mulf %175, %176 : vector<24x128xf32>
      %178 = arith.addf %173, %177 : vector<24x128xf32>
      %c2_i32_37 = arith.constant 2 : i32
      %179 = tpu.dynamic_rotate %174 by %c2_i32_37 dim 0 : vector<24x128xf32>, i32 -> vector<24x128xf32>
      %180 = vector.broadcast %26 : f32 to vector<24x128xf32>
      %181 = arith.mulf %179, %180 : vector<24x128xf32>
      %182 = arith.addf %178, %181 : vector<24x128xf32>
      %c1_i32_38 = arith.constant 1 : i32
      %183 = tpu.dynamic_rotate %174 by %c1_i32_38 dim 0 : vector<24x128xf32>, i32 -> vector<24x128xf32>
      %184 = vector.broadcast %33 : f32 to vector<24x128xf32>
      %185 = arith.mulf %183, %184 : vector<24x128xf32>
      %186 = arith.addf %182, %185 : vector<24x128xf32>
      %187 = vector.broadcast %40 : f32 to vector<24x128xf32>
      %188 = arith.mulf %174, %187 : vector<24x128xf32>
      %189 = arith.addf %186, %188 : vector<24x128xf32>
      %c23_i32_39 = arith.constant 23 : i32
      %190 = tpu.dynamic_rotate %174 by %c23_i32_39 dim 0 : vector<24x128xf32>, i32 -> vector<24x128xf32>
      %191 = vector.broadcast %47 : f32 to vector<24x128xf32>
      %192 = arith.mulf %190, %191 : vector<24x128xf32>
      %193 = arith.addf %189, %192 : vector<24x128xf32>
      %c22_i32_40 = arith.constant 22 : i32
      %194 = tpu.dynamic_rotate %174 by %c22_i32_40 dim 0 : vector<24x128xf32>, i32 -> vector<24x128xf32>
      %195 = vector.broadcast %54 : f32 to vector<24x128xf32>
      %196 = arith.mulf %194, %195 : vector<24x128xf32>
      %197 = arith.addf %193, %196 : vector<24x128xf32>
      %c21_i32_41 = arith.constant 21 : i32
      %198 = tpu.dynamic_rotate %174 by %c21_i32_41 dim 0 : vector<24x128xf32>, i32 -> vector<24x128xf32>
      %199 = vector.broadcast %61 : f32 to vector<24x128xf32>
      %200 = arith.mulf %198, %199 : vector<24x128xf32>
      %201 = arith.addf %197, %200 : vector<24x128xf32>
      %c126_i32 = arith.constant 126 : i32
      %202 = tpu.dynamic_rotate %14 by %c126_i32 dim 1 : vector<24x128xf32>, i32 -> vector<24x128xf32>
      %c3_i32_42 = arith.constant 3 : i32
      %203 = tpu.dynamic_rotate %202 by %c3_i32_42 dim 0 : vector<24x128xf32>, i32 -> vector<24x128xf32>
      %204 = vector.broadcast %20 : f32 to vector<24x128xf32>
      %205 = arith.mulf %203, %204 : vector<24x128xf32>
      %206 = arith.addf %201, %205 : vector<24x128xf32>
      %c2_i32_43 = arith.constant 2 : i32
      %207 = tpu.dynamic_rotate %202 by %c2_i32_43 dim 0 : vector<24x128xf32>, i32 -> vector<24x128xf32>
      %208 = vector.broadcast %27 : f32 to vector<24x128xf32>
      %209 = arith.mulf %207, %208 : vector<24x128xf32>
      %210 = arith.addf %206, %209 : vector<24x128xf32>
      %c1_i32_44 = arith.constant 1 : i32
      %211 = tpu.dynamic_rotate %202 by %c1_i32_44 dim 0 : vector<24x128xf32>, i32 -> vector<24x128xf32>
      %212 = vector.broadcast %34 : f32 to vector<24x128xf32>
      %213 = arith.mulf %211, %212 : vector<24x128xf32>
      %214 = arith.addf %210, %213 : vector<24x128xf32>
      %215 = vector.broadcast %41 : f32 to vector<24x128xf32>
      %216 = arith.mulf %202, %215 : vector<24x128xf32>
      %217 = arith.addf %214, %216 : vector<24x128xf32>
      %c23_i32_45 = arith.constant 23 : i32
      %218 = tpu.dynamic_rotate %202 by %c23_i32_45 dim 0 : vector<24x128xf32>, i32 -> vector<24x128xf32>
      %219 = vector.broadcast %48 : f32 to vector<24x128xf32>
      %220 = arith.mulf %218, %219 : vector<24x128xf32>
      %221 = arith.addf %217, %220 : vector<24x128xf32>
      %c22_i32_46 = arith.constant 22 : i32
      %222 = tpu.dynamic_rotate %202 by %c22_i32_46 dim 0 : vector<24x128xf32>, i32 -> vector<24x128xf32>
      %223 = vector.broadcast %55 : f32 to vector<24x128xf32>
      %224 = arith.mulf %222, %223 : vector<24x128xf32>
      %225 = arith.addf %221, %224 : vector<24x128xf32>
      %c21_i32_47 = arith.constant 21 : i32
      %226 = tpu.dynamic_rotate %202 by %c21_i32_47 dim 0 : vector<24x128xf32>, i32 -> vector<24x128xf32>
      %227 = vector.broadcast %62 : f32 to vector<24x128xf32>
      %228 = arith.mulf %226, %227 : vector<24x128xf32>
      %229 = arith.addf %225, %228 : vector<24x128xf32>
      %c125_i32 = arith.constant 125 : i32
      %230 = tpu.dynamic_rotate %14 by %c125_i32 dim 1 : vector<24x128xf32>, i32 -> vector<24x128xf32>
      %c3_i32_48 = arith.constant 3 : i32
      %231 = tpu.dynamic_rotate %230 by %c3_i32_48 dim 0 : vector<24x128xf32>, i32 -> vector<24x128xf32>
      %232 = vector.broadcast %21 : f32 to vector<24x128xf32>
      %233 = arith.mulf %231, %232 : vector<24x128xf32>
      %234 = arith.addf %229, %233 : vector<24x128xf32>
      %c2_i32_49 = arith.constant 2 : i32
      %235 = tpu.dynamic_rotate %230 by %c2_i32_49 dim 0 : vector<24x128xf32>, i32 -> vector<24x128xf32>
      %236 = vector.broadcast %28 : f32 to vector<24x128xf32>
      %237 = arith.mulf %235, %236 : vector<24x128xf32>
      %238 = arith.addf %234, %237 : vector<24x128xf32>
      %c1_i32_50 = arith.constant 1 : i32
      %239 = tpu.dynamic_rotate %230 by %c1_i32_50 dim 0 : vector<24x128xf32>, i32 -> vector<24x128xf32>
      %240 = vector.broadcast %35 : f32 to vector<24x128xf32>
      %241 = arith.mulf %239, %240 : vector<24x128xf32>
      %242 = arith.addf %238, %241 : vector<24x128xf32>
      %243 = vector.broadcast %42 : f32 to vector<24x128xf32>
      %244 = arith.mulf %230, %243 : vector<24x128xf32>
      %245 = arith.addf %242, %244 : vector<24x128xf32>
      %c23_i32_51 = arith.constant 23 : i32
      %246 = tpu.dynamic_rotate %230 by %c23_i32_51 dim 0 : vector<24x128xf32>, i32 -> vector<24x128xf32>
      %247 = vector.broadcast %49 : f32 to vector<24x128xf32>
      %248 = arith.mulf %246, %247 : vector<24x128xf32>
      %249 = arith.addf %245, %248 : vector<24x128xf32>
      %c22_i32_52 = arith.constant 22 : i32
      %250 = tpu.dynamic_rotate %230 by %c22_i32_52 dim 0 : vector<24x128xf32>, i32 -> vector<24x128xf32>
      %251 = vector.broadcast %56 : f32 to vector<24x128xf32>
      %252 = arith.mulf %250, %251 : vector<24x128xf32>
      %253 = arith.addf %249, %252 : vector<24x128xf32>
      %c21_i32_53 = arith.constant 21 : i32
      %254 = tpu.dynamic_rotate %230 by %c21_i32_53 dim 0 : vector<24x128xf32>, i32 -> vector<24x128xf32>
      %255 = vector.broadcast %63 : f32 to vector<24x128xf32>
      %256 = arith.mulf %254, %255 : vector<24x128xf32>
      %257 = arith.addf %253, %256 : vector<24x128xf32>
      %258 = vector.extract_strided_slice %257 {offsets = [0, 0], sizes = [16, 16], strides = [1, 1]} : vector<24x128xf32> to vector<16x16xf32>
      %259 = arith.negf %258 : vector<16x16xf32>
      %260 = math.exp %259 : vector<16x16xf32>
      %cst = arith.constant 1.000000e+00 : f32
      %261 = vector.broadcast %cst : f32 to vector<16x16xf32>
      %262 = arith.addf %261, %260 : vector<16x16xf32>
      %263 = arith.divf %261, %262 : vector<16x16xf32>
      %c0_54 = arith.constant 0 : index
      %c0_55 = arith.constant 0 : index
      %c0_56 = arith.constant 0 : index
      %c0_57 = arith.constant 0 : index
      %264 = vector.load %arg4[%c0_54, %c0_55, %c0_56, %c0_57] : memref<1x1x16x16xf32, #tpu.memory_space<vmem>>, vector<1x1x16x16xf32>
      %265 = vector.shape_cast %264 : vector<1x1x16x16xf32> to vector<16x16xf32>
      %266 = vector.shape_cast %263 : vector<16x16xf32> to vector<1x1x16x16xf32>
      tpu.vector_store %arg4[%c0_54, %c0_55, %c0_56, %c0_57], %266 {strides = array<i32>} : memref<1x1x16x16xf32, #tpu.memory_space<vmem>>, vector<1x1x16x16xf32>,
    } else {
    }
    return
  }
  func.func @transform_0(%arg0: i32, %arg1: i32) -> i32 {
    %c0_i32 = arith.constant 0 : i32
    %c0_i32_0 = arith.constant 0 : i32
    return %c0_i32 : i32
  }
  func.func @transform_1(%arg0: i32, %arg1: i32) -> (i32, i32, i32, i32) {
    %c0_i32 = arith.constant 0 : i32
    %c0_i32_0 = arith.constant 0 : i32
    %c0_i32_1 = arith.constant 0 : i32
    return %arg0, %arg1, %c0_i32, %c0_i32_0 : i32, i32, i32, i32
  }
  func.func @transform_2(%arg0: i32, %arg1: i32) -> (i32, i32, i32, i32) {
    %c0_i32 = arith.constant 0 : i32
    %c0_i32_0 = arith.constant 0 : i32
    %c0_i32_1 = arith.constant 0 : i32
    %c0_i32_2 = arith.constant 0 : i32
    return %arg0, %c0_i32, %c0_i32_0, %c0_i32_1 : i32, i32, i32, i32
  }
}

</mosaic_0001>

<bundles_post_ra>
// kernel: tpu_custom_call.1
= control target key start
LH: loop header
LB: loop body
LE: loop exit
PB: predicated region body
PF: predicated region fallthrough
CT: control target
= control target key end

     0   :  { %s2251_s0 = inlined_call_operand.hbm [shape: f32[49], index: 0, kind: input, shape index: {}]   ;;  %s2252_s1 = inlined_call_operand.hbm [shape: f32[2,4,16,16], index: 1, kind: input, shape index: {}]   ;;  %s2253_s2 = inlined_call_operand.hbm [shape: f32[2,1,16,16], index: 2, kind: output, shape index: {}]  }
   0x1   :  { %2268 = sst [smem:[#allocation18_spill]] %s2251_s0 }
   0x2   :  { %2269 = sst [smem:[#allocation19_spill]] %s2253_s2 }
   0x3   :  { %7 = vsyncpa [#allocation6], 0 }
   0x4   :  { %8 = vsyncpa [#allocation4], 0 }
   0x5   :  { %10 = vsyncpa [#allocation4 + $0x1], 0 }
   0x6   :  { %11 = vsyncpa [#allocation5], 0 }
   0x7   :  { %13 = vsyncpa [#allocation5 + $0x1], 0  ;;  %s1309_s9 = smov 0   ;;  %s1311_s10 = smov 0  }
   0x8   :  { %s1313_s11 = smov 0   ;;  %s1315_s12 = smov 0  }
   0x9   :  { %s1317_s13 = smov 0   ;;  %s1319_s14 = smov 0  }
   0xa   :  { %s1321_s15 = smov 0   ;;  %s1323_s16 = smov 0  }
   0xb   :  { %s1325_s17 = smov 0   ;;  %s1327_s18 = smov 0  }
   0xc   :  { %s1329_s19 = smov 0  }
   0xd LB: > { %2270 = sst [smem:[#allocation12_spill]] %s1238_s9  ;;  %s901_s20 = sadd.s32 4294967295, %s1278_s19   ;;  %s1278_s19 = sphi %s1329_s19, %s2308_s19   ;;  %s1274_s18 = sphi %s1327_s18, %s2307_s18   ;;  %s1270_s17 = sphi %s1325_s17, %s2299_s17   ;;  %s1266_s16 = sphi %s1323_s16, %s2306_s16   ;;  %s1262_s15 = sphi %s1321_s15, %s2298_s15   ;;  %s1258_s14 = sphi %s1319_s14, %s2305_s14   ;;  %s1254_s13 = sphi %s1317_s13, %s2304_s13   ;;  %s1250_s12 = sphi %s1315_s12, %s2303_s12   ;;  %s1246_s11 = sphi %s1313_s11, %s2302_s11   ;;  %s1242_s10 = sphi %s1311_s10, %s2301_s10   ;;  %s1238_s9 = sphi %s1309_s9, %s2300_s9  }
   0xe   : > { %2271 = sst [smem:[#allocation13_spill]] %s1270_s17  ;;  %s902_s21 = sadd.s32 4294967294, %s1278_s19  }
   0xf   : > { %2272 = sst [smem:[#allocation14_spill]] %s1278_s19  ;;  %p68_p0 = scmp.ne.s32.totalorder %s1258_s14, %s1254_s13 }
  0x10   : > { %p69_p1 = scmp.eq.s32.totalorder %s1278_s19, 0  ;;  %p74_p2 = scmp.ne.s32.totalorder %s1254_s13, %s1250_s12 }
  0x11   : > { %p1369_p3 = scmp.eq.s32.totalorder %s901_s20, 0  ;;  %p97_p5 = scmp.ne.s32.totalorder %s1246_s11, %s1242_s10 }
  0x12   : > { %p1374_p4 = por %p69_p1, %p68_p0  ;;  %p98_p7 = scmp.eq.s32.totalorder %s901_s20, 3 }
  0x13   : > { %s2273_s23 = scalar_select %p1369_p3, 1, 0 }
  0x14   : > { %p1382_p6 = por %p1369_p3, %p74_p2  ;;  %p103_p8 = scmp.ne.s32.totalorder %s1242_s10, %s1238_s9 }
  0x15   : > { %p104_p9 = scmp.eq.s32.totalorder %s902_s21, 3  ;;  %p1388_p10 = por %p98_p7, %p97_p5 }
  0x16   : > { %s2275_s26 = scalar_select %p1382_p6, 1, 0 }
  0x17   : > { %s2276_s27 = scalar_select %p1388_p10, 1, 0 }
  0x18   : > { %p903_p11 = scmp.ge.s32.totalorder %s1278_s19, 1  ;;  %p1393_p12 = por %p104_p9, %p103_p8 }
  0x19   : > { %2277 = sst [smem:[#allocation15_spill]] %s2276_s27  ;;  %p111_p13 = scmp.lt.s32.totalorder %s1278_s19, 5 }
  0x1a   : > { %s2278_s28 = scalar_select %p1393_p12, 1, 0 }
  0x1b   : > { %p1398_p0 = pnand %p903_p11, %p111_p13  ;;  %p998_p1 = scmp.lt.s32.totalorder %s1278_s19, 4 }
  0x1c   : > { %2279 = sst [smem:[#allocation16_spill]] %s2278_s28  ;;  %s28_s3 = sadd.s32 1, %s1270_s17 }
  0x1d   : > { %p985_p2 = pneg %p1398_p0  ;;  %p1407_p6 = pnand %p998_p1, %p1374_p4 }
  0x1e   : > { %p1414_p7 = scmp.ge.s32.totalorder %s28_s3, 2  ;;  %s2283_s0 = sld [smem:[#allocation18_spill]] }
  0x1f   : > { %p986_p5 = pnand %p985_p2, %p1369_p3 }
  0x21   : > { %p1111_p9 = pneg %p986_p5 }
  0x24   : > { %s1109_s7 = scalar_lea.hbm %s2283_s0, 16 }
  0x25   : > { %p1110_p8 = scmp.ne.s32.totalorder %s2283_s0, %s1109_s7  ;;  %p1116_p13 = scmp.lt.u32.totalorder %s1109_s7, %s2283_s0 }
  0x27   : > { %p1112_p4 = pnand %p1111_p9, %p1110_p8 }
  0x29   : > { %p1113_p11 = pneg %p1112_p4 }
  0x2b   : > { %p1118_p1 = pnand %p1116_p13, %p1113_p11 }
  0x2d   : > { %1121 = shalt.err (!%p1118_p1)
}
  0x2e   : > { %s1280_s25 = smov [#allocation3]   ;;  %s2310_s3 = smov (%p1414_p7, %s28_s3), 0 }
  0x2f   : > { %988 = dma.hbm_to_smem (!%p986_p5), %s2283_s0, 16, %s1280_s25, [#allocation6]  }
  0x30   : > { %2284 = sst [smem:[#allocation17_spill]] %s2310_s3  ;;  %s31_s5 = sadd.s32 1, %s1274_s18 }
  0x31   : > { %s133_s6 = sand.u32 1, %s1258_s14   ;;  %s2312_s5 = smov (!%p1414_p7, %s31_s5), %s1274_s18 }
  0x32   : > { %s57_s22 = ssub.s32 %s1270_s17, %s2310_s3  ;;  %p33_p2 = scmp.ge.s32.totalorder %s2312_s5, 2 }
  0x33   : > { %s906_s24 = sshll.u32 %s133_s6, 5  ;;  %s975_s7 = sshll.u32 %s1270_s17, 2 }
  0x34   : > { %s2314_s5 = smov (%p33_p2, %s2312_s5), 0  ;;  %s909_s8 = sshll.u32 %s1274_s18, 3 }
  0x35   : > { %s137_s12 = scalar_lea.vmem [#allocation7], %s906_s24  ;;  %s56_s21 = ssub.s32 %s1274_s18, %s2314_s5 }
  0x36   : > { %s147_s20 = sshll.u32 %s137_s12, 4  ;;  %s144_s25 = sadd.s32 %s975_s7, %s909_s8  ;;  %s1462_s20 = int_to_ptr.vmem [resolvable:$true] %s147_s20 }
  0x37   : > { %s58_s4 = sor.u32 %s57_s22, %s56_s21  ;;  %p85_p5 = scmp.eq.s32.totalorder %s56_s21, 0 }
  0x38   : > { %p59_p8 = scmp.eq.s32.totalorder %s58_s4, 0  ;;  %s910_s0 = sshll.u32 %s144_s25, 7 }
  0x39   : > { %s2285_s28 = sadd.s32 1, %s1246_s11  ;;  %s2286_s3 = sadd.s32 1, %s1258_s14 }
  0x3a   : > { %s1450_s9 = scalar_select %p85_p5, %s1246_s11, %s2285_s28  }
  0x3b   : > { %s1455_s19 = scalar_select %p59_p8, %s1258_s14, %s2286_s3  }
  0x3c   : > { %s1460_s27 = scalar_lea.hbm %s2252_s1, %s910_s0  ;;  %s1464_s22 = scalar_lea.sflag [#allocation4], %s133_s6 }
  0x3d   : > { %s1122_s24 = scalar_lea.hbm %s1460_s27, 512  ;;  %p1124_p9 = pneg %p1407_p6 }
  0x3e   : > { %p1123_p7 = scmp.ne.s32.totalorder %s1460_s27, %s1122_s24  ;;  %s1127_s0 = scalar_lea.hbm %s2252_s1, 2048 }
  0x3f   : > { %p1128_p13 = scmp.lt.u32.totalorder %s1460_s27, %s2252_s1  ;;  %p1129_p1 = scmp.lt.u32.totalorder %s1127_s0, %s1122_s24 }
  0x40   : > { %p1125_p4 = pnand %p1124_p9, %p1123_p7  ;;  %p1131_p5 = scmp.lt.u32.totalorder %s1122_s24, %s1460_s27 }
  0x41   : > { %p1130_p2 = por %p1129_p1, %p1128_p13 }
  0x42   : > { %p1126_p11 = pneg %p1125_p4 }
  0x43   : > { %p1132_p8 = por %p1131_p5, %p1130_p2 }
  0x45   : > { %p1133_p12 = pnand %p1132_p8, %p1126_p11 }
  0x47   : > { %1136 = shalt.err (!%p1133_p12)
}
  0x48   : > { %s1137_s6 = scalar_lea.vmem %s1462_s20, 512  ;;  %s1281_s7 = smov [#allocation7]  }
  0x49   : > { %p1138_p7 = scmp.ne.s32.totalorder %s1462_s20, %s1137_s6  ;;  %s1142_s8 = sshll.u32 %s1281_s7, 4  ;;  %s1143_s8 = int_to_ptr.vmem [resolvable:$false] %s1142_s8 }
  0x4a   : > { %s1144_s12 = scalar_lea.vmem %s1143_s8, 1024  ;;  %p1145_p3 = scmp.lt.s32.totalorder %s1462_s20, %s1143_s8 }
  0x4b   : > { %p1140_p4 = pnand %p1138_p7, %p1124_p9  ;;  %p1146_p13 = scmp.lt.s32.totalorder %s1144_s12, %s1137_s6 }
  0x4d   : > { %p1141_p10 = pneg %p1140_p4  ;;  %p1147_p1 = por %p1146_p13, %p1145_p3 }
  0x4f   : > { %p1148_p2 = pnand %p1147_p1, %p1141_p10 }
  0x51   : > { %1151 = shalt.err (!%p1148_p2)
}
  0x52   : > { %s1282_s21 = smov 128   ;;  %s1283_s25 = smov 8  }
  0x53   : > { %992 = dma.hbm_to_vmem [thread:$0]  (!%p1407_p6), %s1460_s27, 512, %s1462_s20, %s1464_s22, %s1282_s21, %s1282_s21, %s1283_s25  }
  0x54   : > { %159 = sbr.rel (%p1398_p0) target bundleno = 395 (0x18b), region = 28  ;;  %p2287_p12 = scmp.ne.s32.totalorder (!%p1398_p0), %s2273_s23, 0 }
  0x5b   : > { %1225 = dma.done.wait (%p2287_p12), [#allocation6], 16  }
  0x5c   : > { %1227 = vsyncadd (%p2287_p12), [#allocation6], 4294967280  ;;  %s165_s4 = sand.u32 1, %s1254_s13   ;;  %p2288_p3 = scmp.ne.s32.totalorder %s2275_s26, 0 }
  0x5d   : > { %s913_s24 = sshll.u32 %s165_s4, 5  ;;  %s166_s28 = scalar_lea.sflag [#allocation4], %s165_s4 }
  0x5e   : > { %s169_s2 = scalar_lea.vmem [#allocation7], %s913_s24 }
  0x5f   : > { %1229 = dma.done.wait (%p2288_p3), %s166_s28, 512  }
  0x60   : > { %1231 = vsyncadd (%p2288_p3), %s166_s28, 4294966784 }
  0x61   : > { %174 = sfence }
  0x62   : > { %s2267_s27 = sand.u32 1, %s1242_s10   ;;  %v192_v0 = vld [vmem:[%s169_s2] sm:$0xff]  ;;  %v193_v1 = vld [vmem:[%s169_s2 + $0x8] sm:$0xff]  ;;  %v915_v2 = vld [vmem:[%s169_s2 + $0x10] sm:$0xff]  ;;  %p917_p6 = scmp.ne.s32.totalorder %s1262_s15, 0 }
  0x63   : > { %s914_s23 = sshll.u32 %s2267_s27, 4  ;;  %v916_v3 = vld [vmem:[%s169_s2 + $0x18] sm:$0xff]  ;;  %v197_v4 = vmax.f32 %v192_v0, %v915_v2  ;;  %vm206_vm0 = vcmask (!%p917_p6), 130048   ;;  %v1284_v6 = vmov (!%p917_p6), 0.0  }
  0x64   : > { %v198_v5 = vmax.f32 %v193_v1, %v916_v3  ;;  %s1506_s29 = scalar_lea.vmem [#allocation8], %s914_s23  ;;  %202 = sbr.rel (%p917_p6) target bundleno = 107 (0x6b), region = 40  ;;  %203 = vst [vmem:[#allocation2] sm:$0xff] (!%p917_p6), %v1284_v6  ;;  %204 = vst [vmem:[#allocation2 + $0x8] sm:$0xff] (!%p917_p6), %v1284_v6 }
  0x65   : > { %205 = vst [vmem:[#allocation2 + $0x10] sm:$0xff] (!%p917_p6), %v1284_v6  ;;  %207 = vst.msk [vmem:[#allocation2] sm:$0xff] (!%p917_p6), %vm206_vm0, %v197_v4 }
  0x66   : > { %208 = vst.msk [vmem:[#allocation2 + $0x8] sm:$0xff] (!%p917_p6), %vm206_vm0, %v198_v5 }
  0x6b PF: > { %p918_p10 = scmp.eq.s32.totalorder %s1262_s15, 0 }
  0x6c   : > { %v213_v7 = vld [vmem:[#allocation2] sm:$0xff] (!%p918_p10)  ;;  %vm217_vm1 = vcmask (!%p918_p10), 130048  }
  0x6d   : > { %212 = sbr.rel (%p918_p10) target bundleno = 116 (0x74), region = 44  ;;  %v214_v8 = vld [vmem:[#allocation2 + $0x8] sm:$0xff] (!%p918_p10)  ;;  %v215_v9 = vmax.f32 (!%p918_p10), %v213_v7, %v197_v4 }
  0x6e   : > { %v216_v10 = vmax.f32 (!%p918_p10), %v214_v8, %v198_v5 }
  0x6f   : > { %218 = vst.msk [vmem:[#allocation2] sm:$0xff] (!%p918_p10), %vm217_vm1, %v215_v9 }
  0x70   : > { %219 = vst.msk [vmem:[#allocation2 + $0x8] sm:$0xff] (!%p918_p10), %vm217_vm1, %v216_v10 }
  0x74 PF: > { %p919_p0 = scmp.ne.s32.totalorder %s1262_s15, 1 }
  0x75   : > { %v226_v11 = vld [vmem:[#allocation2 + $0x10] sm:$0xff] (!%p919_p0)  ;;  %s1285_s26 = smov (!%p919_p0), 3   ;;  %s1286_s30 = smov (!%p919_p0), 2   ;;  %v288_v14 = vlaneseq (!%p919_p0)  ;;  %vm785_vm8 = vcmask (!%p919_p0), 130048  }
  0x76   : > { %223 = sbr.rel (%p919_p0) target bundleno = 367 (0x16f), region = 48  ;;  %v1511_v12 = vld [vmem:[#allocation2] sm:$0xff] (!%p919_p0)  ;;  %283 = vrot.lane.b32.xlu1 (!%p919_p0), %v226_v11, %s1285_s26  ;;  %s1287_s20 = smov (!%p919_p0), 1   ;;  %v532_v17 = vrot.slane (!%p919_p0), %v226_v11, 1  ;;  %v502_v20 = vrot.slane (!%p919_p0), %v226_v11, 5  ;;  %v512_v22 = vrot.slane (!%p919_p0), %v226_v11, 6 }
  0x77   : > { %279 = vrot.lane.b32.xlu0 (!%p919_p0), %v1511_v12, %s1285_s26  ;;  %v1514_v13 = vld [vmem:[#allocation2 + $0x8] sm:$0xff] (!%p919_p0)  ;;  %s1288_s15 = smov (!%p919_p0), 127   ;;  %s1289_s22 = smov (!%p919_p0), 126   ;;  %v1527_v15 = vshrl.u32 (!%p919_p0), %v288_v14, 7  ;;  %v500_v23 = vrot.slane (!%p919_p0), %v1511_v12, 5  ;;  %v510_v27 = vrot.slane (!%p919_p0), %v1511_v12, 6 }
  0x78   : > { %s1290_s0 = smov (!%p919_p0), 125   ;;  %v531_v16 = vrot.slane (!%p919_p0), %v1514_v13, 1  ;;  %v501_v19 = vrot.slane (!%p919_p0), %v1514_v13, 5  ;;  %v511_v21 = vrot.slane (!%p919_p0), %v1514_v13, 6  ;;  %v521_v24 = vrot.slane (!%p919_p0), %v1514_v13, 7  ;;  %s1595_s17 = sld [smem:[#allocation3]] (!%p919_p0) }
  0x79   : > { %vm328_vm2 = vcmp.lt.s32.totalorder (!%p919_p0), %v1527_v15, 7  ;;  %vm290_vm3 = vcmp.lt.s32.totalorder (!%p919_p0), %v1527_v15, 3  ;;  %vm301_vm4 = vcmp.lt.s32.totalorder (!%p919_p0), %v1527_v15, 2  ;;  %v520_v30 = vrot.slane (!%p919_p0), %v1511_v12, 7  ;;  %s943_s3 = sld [smem:[#allocation3 + $0x18]] (!%p919_p0)  ;;  %s1597_s6 = sld [smem:[#allocation3 + $0x7]] (!%p919_p0) }
  0x7a   : > { %358 = vrot.lane.b32.xlu1 (!%p919_p0), %v1511_v12, %s1286_s30  ;;  %v1533_v18 = vsel (!%p919_p0), %vm328_vm2, %v531_v16, %v532_v17  ;;  %v1542_v25 = vsel (!%p919_p0), %vm290_vm3, %v500_v23, %v501_v19  ;;  %v1546_v26 = vsel (!%p919_p0), %vm290_vm3, %v502_v20, %v500_v23  ;;  %v1552_v28 = vsel (!%p919_p0), %vm301_vm4, %v510_v27, %v511_v21  ;;  %s1599_s7 = sld [smem:[#allocation3 + $0xe]] (!%p919_p0)  ;;  %s1601_s8 = sld [smem:[#allocation3 + $0x15]] (!%p919_p0) }
  0x7b   : > { %281 = vrot.lane.b32.xlu0 (!%p919_p0), %v1514_v13, %s1285_s26  ;;  %v1556_v29 = vsel (!%p919_p0), %vm301_vm4, %v512_v22, %v510_v27  ;;  %vm312_vm5 = vcmp.lt.s32.totalorder (!%p919_p0), %v1527_v15, 1  ;;  %v522_v31 = vrot.slane (!%p919_p0), %v226_v11, 7  ;;  %v541_v33 = vrot.slane (!%p919_p0), %v1514_v13, 2  ;;  %s1603_s12 = sld [smem:[#allocation3 + $0x1c]] (!%p919_p0)  ;;  %s1605_s21 = sld [smem:[#allocation3 + $0x23]] (!%p919_p0) }
  0x7c   : > { %v1562_v32 = vsel (!%p919_p0), %vm312_vm5, %v520_v30, %v521_v24  ;;  %v542_v34 = vrot.slane (!%p919_p0), %v226_v11, 2  ;;  %vm339_vm6 = vcmp.lt.s32.totalorder (!%p919_p0), %v1527_v15, 6  ;;  %v551_v35 = vrot.slane (!%p919_p0), %v1514_v13, 3  ;;  %s1607_s25 = sld [smem:[#allocation3 + $0x2a]] (!%p919_p0)  ;;  %s1609_s4 = sld [smem:[#allocation3 + $0x16]] (!%p919_p0) }
  0x7d   : > { %v552_v36 = vrot.slane %v226_v11, 3  ;;  %v1569_v37 = vsel %vm312_vm5, %v522_v31, %v520_v30  ;;  %vm350_vm7 = vcmp.lt.s32.totalorder %v1527_v15, 5  ;;  %v530_v39 = vrot.slane %v1511_v12, 1  ;;  %s1611_s24 = sld [smem:[#allocation3 + $0x1]]  ;;  %s1613_s28 = sld [smem:[#allocation3 + $0x8]] }
  0x7e   : > { %362 = vrot.lane.b32.xlu1 %v226_v11, %s1286_s30  ;;  %v1574_v38 = vsel %vm339_vm6, %v541_v33, %v542_v34  ;;  %v540_v40 = vrot.slane %v1511_v12, 2  ;;  %v550_v44 = vrot.slane %v1511_v12, 3  ;;  %s1615_s2 = sld [smem:[#allocation3 + $0xf]]  ;;  %s1617_s23 = sld [smem:[#allocation3 + $0x1d]]  ;;  %v293_v47 = vstv %s1595_s17 }
  0x7f   : > { %360 = vrot.lane.b32.xlu0 %v1514_v13, %s1286_s30  ;;  %v1580_v41 = vsel %vm350_vm7, %v551_v35, %v552_v36  ;;  %v1584_v42 = vsel %vm328_vm2, %v530_v39, %v531_v16  ;;  %s1619_s26 = sld [smem:[#allocation3 + $0x24]]  ;;  %s1621_s30 = sld [smem:[#allocation3 + $0x2b]]  ;;  %v276_v46 = vstv %s943_s3  ;;  %v304_v48 = vstv %s1597_s6 }
  0x80   : > { %v1588_v43 = vsel %vm339_vm6, %v540_v40, %v541_v33  ;;  %v1593_v45 = vsel %vm350_vm7, %v550_v44, %v551_v35  ;;  %v315_v49 = vstv %s1599_s7  ;;  %v320_v50 = vstv %s1601_s8  ;;  %s1714_s17 = sld [smem:[#allocation3 + $0x1e]]  ;;  %s1716_s3 = sld [smem:[#allocation3 + $0x25]] }
  0x81   : > { %v331_v51 = vstv %s1603_s12  ;;  %v277_v54 = vmul.f32 %v276_v46, %v1511_v12  ;;  %v278_v55 = vmul.f32 %v276_v46, %v1514_v13  ;;  %v342_v56 = vstv %s1605_s21  ;;  %s1730_s6 = sld [smem:[#allocation3 + $0x2c]]  ;;  %s1737_s7 = sld [smem:[#allocation3 + $0x3]] }
  0x82   : > { %431 = vrot.lane.b32.xlu1 %v1514_v13, %s1287_s20  ;;  %v353_v57 = vstv %s1607_s25  ;;  %v394_v60 = vstv %s1609_s4  ;;  %s1744_s8 = sld [smem:[#allocation3 + $0xa]]  ;;  %s1757_s12 = sld [smem:[#allocation3 + $0x11]] }
  0x83   : > { %429 = vrot.lane.b32.xlu0 %v1511_v12, %s1287_s20  ;;  %v369_v61 = vstv %s1611_s24  ;;  %v379_v1 = vstv %s1613_s28  ;;  %s1761_s21 = sld [smem:[#allocation3 + $0x1f]]  ;;  %s1840_s25 = sld [smem:[#allocation3 + $0x26]] }
  0x84   : > { %v389_v3 = vstv %s1615_s2  ;;  %v404_v4 = vstv %s1617_s23  ;;  %s1846_s4 = sld [smem:[#allocation3 + $0x19]]  ;;  %s1852_s24 = sld [smem:[#allocation3 + $0x2d]] }
  0x85   : > { %v414_v5 = vstv %s1619_s26  ;;  %v424_v9 = vstv %s1621_s30  ;;  %s1859_s28 = sld [smem:[#allocation3 + $0x4]]  ;;  %s1861_s2 = sld [smem:[#allocation3 + $0xb]] }
  0x86   : > { %560 = vrot.lane.b32.xlu1 %v1511_v12, %s1288_s15  ;;  %s1869_s23 = sld [smem:[#allocation3 + $0x12]]  ;;  %s1871_s26 = sld [smem:[#allocation3 + $0x20]] }
  0x87   : > { %433 = vrot.lane.b32.xlu0 %v226_v11, %s1287_s20  ;;  %s1623_s20 = sld [smem:[#allocation3 + $0x17]] }
  0x88   : > { %s1878_s30 = sld [smem:[#allocation3 + $0x27]] }
  0x89   : > { %s1923_s27 = sld [smem:[#allocation3 + $0x2f]] }
  0x8a   : > { %564 = vrot.lane.b32.xlu1 %v226_v11, %s1288_s15 }
  0x8b   : > { %562 = vrot.lane.b32.xlu0 %v1514_v13, %s1288_s15  ;;  %s1670_s15 = sld [smem:[#allocation3 + $0x2]] }
  0x8d   : > { %v465_v10 = vstv %s1623_s20  ;;  %s1892_s20 = sld [smem:[#allocation3 + $0x1a]] }
  0x8e   : > { %633 = vrot.lane.b32.xlu1 %v1514_v13, %s1289_s22 }
  0x8f   : > { %631 = vrot.lane.b32.xlu0 %v1511_v12, %s1289_s22 }
  0x92   : > { %702 = vrot.lane.b32.xlu1 %v1511_v12, %s1290_s0 }
  0x93   : > { %635 = vrot.lane.b32.xlu0 %v226_v11, %s1289_s22  ;;  %s1685_s22 = sld [smem:[#allocation3 + $0x9]] }
  0x96   : > { %706 = vrot.lane.b32.xlu1 %v226_v11, %s1290_s0 }
  0x97   : > { %704 = vrot.lane.b32.xlu0 %v1514_v13, %s1290_s0  ;;  %s1691_s0 = sld [smem:[#allocation3 + $0x10]] }
  0xe8   : > { %v1630_v52 = vpop.permute.xlu1 %283 }
  0xe9   : > { %v1632_v53 = vpop.permute.xlu0 %279  ;;  %v287_v58 = vrot.slane %v1630_v52, 5  ;;  %v300_v59 = vrot.slane %v1630_v52, 6  ;;  %v311_v62 = vrot.slane %v1630_v52, 7  ;;  %v327_v11 = vrot.slane %v1630_v52, 1 }
  0xea   : > { %v285_v63 = vrot.slane %v1632_v53, 5  ;;  %v298_v0 = vrot.slane %v1632_v53, 6  ;;  %v309_v2 = vrot.slane %v1632_v53, 7  ;;  %v338_v12 = vrot.slane %v1630_v52, 2 }
  0xeb   : > { %v325_v17 = vrot.slane %v1632_v53, 1  ;;  %v336_v30 = vrot.slane %v1632_v53, 2 }
  0xec   : > { %v292_v6 = vsel %vm290_vm3, %v287_v58, %v285_v63  ;;  %v303_v7 = vsel %vm301_vm4, %v300_v59, %v298_v0  ;;  %v314_v16 = vsel %vm312_vm5, %v311_v62, %v309_v2  ;;  %v1663_v27 = vpop.permute.xlu1 %358  ;;  %v349_v58 = vrot.slane %v1630_v52, 3 }
  0xed   : > { %v282_v8 = vpop.permute.xlu0 %281  ;;  %v294_v13 = vmul.f32 %v293_v47, %v292_v6  ;;  %v305_v22 = vmul.f32 %v304_v48, %v303_v7  ;;  %v316_v36 = vmul.f32 %v315_v49, %v314_v16  ;;  %v321_v62 = vmul.f32 %v320_v50, %v1632_v53 }
  0xee   : > { %v286_v14 = vrot.slane %v282_v8, 5  ;;  %v299_v19 = vrot.slane %v282_v8, 6  ;;  %v310_v20 = vrot.slane %v282_v8, 7  ;;  %v326_v24 = vrot.slane %v282_v8, 1 }
  0xef   : > { %v296_v21 = vadd.f32 %v294_v13, %v277_v54  ;;  %v337_v34 = vrot.slane %v282_v8, 2  ;;  %v348_v40 = vrot.slane %v282_v8, 3  ;;  %v322_v6 = vmul.f32 %v320_v50, %v282_v8 }
  0xf0   : > { %v291_v23 = vsel %vm290_vm3, %v285_v63, %v286_v14  ;;  %v302_v33 = vsel %vm301_vm4, %v298_v0, %v299_v19  ;;  %v313_v39 = vsel %vm312_vm5, %v309_v2, %v310_v20  ;;  %v329_v54 = vsel %vm328_vm2, %v326_v24, %v327_v11  ;;  %v1683_v52 = vpop.permute.xlu1 %362 }
  0xf1   : > { %v295_v31 = vmul.f32 %v293_v47, %v291_v23  ;;  %v307_v35 = vadd.f32 %v305_v22, %v296_v21  ;;  %v306_v46 = vmul.f32 %v304_v48, %v302_v33  ;;  %v330_v47 = vsel %vm328_vm2, %v325_v17, %v326_v24 }
  0xf2   : > { %v347_v63 = vrot.slane %v1632_v53, 3  ;;  %v317_v2 = vmul.f32 %v315_v49, %v313_v39  ;;  %v341_v48 = vsel %vm339_vm6, %v336_v30, %v337_v34  ;;  %v332_v7 = vmul.f32 %v331_v51, %v330_v47  ;;  %v1705_v30 = vpop.permute.xlu0 %360 }
  0xf3   : > { %v297_v44 = vadd.f32 %v295_v31, %v278_v55  ;;  %v318_v59 = vadd.f32 %v316_v36, %v307_v35  ;;  %v333_v11 = vmul.f32 %v331_v51, %v329_v54  ;;  %v340_v13 = vsel %vm339_vm6, %v337_v34, %v338_v12 }
  0xf4   : > { %v352_v49 = vsel %vm350_vm7, %v347_v63, %v348_v40  ;;  %v364_v50 = vrot.slane %v1663_v27, 5  ;;  %v374_v8 = vrot.slane %v1663_v27, 6  ;;  %v343_v12 = vmul.f32 %v342_v56, %v341_v48 }
  0xf5   : > { %v308_v0 = vadd.f32 %v306_v46, %v297_v44  ;;  %v323_v55 = vadd.f32 %v321_v62, %v318_v59  ;;  %v351_v14 = vsel %vm350_vm7, %v348_v40, %v349_v58  ;;  %v384_v16 = vrot.slane %v1663_v27, 7 }
  0xf6   : > { %v366_v19 = vrot.slane %v1683_v52, 5  ;;  %v376_v20 = vrot.slane %v1683_v52, 6  ;;  %v386_v21 = vrot.slane %v1683_v52, 7  ;;  %v344_v22 = vmul.f32 %v342_v56, %v340_v13 }
  0xf7   : > { %v319_v53 = vadd.f32 %v317_v2, %v308_v0  ;;  %v334_v51 = vadd.f32 %v332_v7, %v323_v55  ;;  %v354_v24 = vmul.f32 %v353_v57, %v352_v49  ;;  %v440_v31 = vstv %s1670_s15  ;;  %s1880_s15 = sld [smem:[#allocation3 + $0x2e]] }
  0xf8   : > { %v355_v34 = vmul.f32 %v353_v57, %v351_v14  ;;  %v368_v35 = vsel %vm290_vm3, %v366_v19, %v364_v50  ;;  %v378_v36 = vsel %vm301_vm4, %v376_v20, %v374_v8  ;;  %v399_v56 = vrot.slane %v1663_v27, 1 }
  0xf9   : > { %v324_v17 = vadd.f32 %v322_v6, %v319_v53  ;;  %v345_v23 = vadd.f32 %v343_v12, %v334_v51  ;;  %v370_v40 = vmul.f32 %v369_v61, %v368_v35  ;;  %v388_v57 = vsel %vm312_vm5, %v386_v21, %v384_v16 }
  0xfa   : > { %v365_v46 = vrot.slane %v1705_v30, 5  ;;  %v375_v54 = vrot.slane %v1705_v30, 6  ;;  %v385_v47 = vrot.slane %v1705_v30, 7  ;;  %v380_v59 = vmul.f32 %v379_v1, %v378_v36 }
  0xfb   : > { %v335_v33 = vadd.f32 %v333_v11, %v324_v17  ;;  %v356_v39 = vadd.f32 %v354_v24, %v345_v23  ;;  %v400_v62 = vrot.slane %v1705_v30, 1  ;;  %v450_v63 = vstv %s1685_s22  ;;  %s1894_s22 = sld [smem:[#allocation3 + $0x5]] }
  0xfc   : > { %v367_v2 = vsel %vm290_vm3, %v364_v50, %v365_v46  ;;  %v377_v6 = vsel %vm301_vm4, %v374_v8, %v375_v54  ;;  %v460_v48 = vstv %s1691_s0  ;;  %v409_v55 = vrot.slane %v1663_v27, 2  ;;  %s1902_s0 = sld [smem:[#allocation3 + $0xc]] }
  0xfd   : > { %v346_v44 = vadd.f32 %v344_v22, %v335_v33  ;;  %v372_v58 = vadd.f32 %v370_v40, %v356_v39  ;;  %v390_v11 = vmul.f32 %v389_v3, %v388_v57  ;;  %v371_v13 = vmul.f32 %v369_v61, %v367_v2 }
  0xfe   : > { %v401_v53 = vrot.slane %v1683_v52, 1  ;;  %v387_v49 = vsel %vm312_vm5, %v384_v16, %v385_v47  ;;  %v403_v50 = vsel %vm328_vm2, %v399_v56, %v400_v62  ;;  %v410_v8 = vrot.slane %v1705_v30, 2 }
  0xff   : > { %v357_v0 = vadd.f32 %v355_v34, %v346_v44  ;;  %v382_v7 = vadd.f32 %v380_v59, %v372_v58  ;;  %v395_v51 = vmul.f32 %v394_v60, %v1663_v27  ;;  %v381_v61 = vmul.f32 %v379_v1, %v377_v6  ;;  %v1769_v1 = vpop.permute.xlu0 %429 }
 0x100   : > { %v419_v17 = vrot.slane %v1663_v27, 3  ;;  %v411_v16 = vrot.slane %v1683_v52, 2  ;;  %v475_v19 = vstv %s1714_s17  ;;  %v485_v20 = vstv %s1716_s3  ;;  %v1771_v27 = vpop.permute.xlu1 %431  ;;  %s1915_s17 = sld [smem:[#allocation3 + $0x21]]  ;;  %s1931_s3 = sld [smem:[#allocation3 + $0x1b]] }
 0x101   : > { %v392_v12 = vadd.f32 %v390_v11, %v382_v7  ;;  %v373_v14 = vadd.f32 %v371_v13, %v357_v0  ;;  %v391_v23 = vmul.f32 %v389_v3, %v387_v49  ;;  %v405_v24 = vmul.f32 %v404_v4, %v403_v50 }
 0x102   : > { %v421_v33 = vrot.slane %v1683_v52, 3  ;;  %v402_v34 = vsel %vm328_vm2, %v400_v62, %v401_v53  ;;  %v413_v35 = vsel %vm339_vm6, %v409_v55, %v410_v8  ;;  %v420_v36 = vrot.slane %v1705_v30, 3 }
 0x103   : > { %v397_v21 = vadd.f32 %v395_v51, %v392_v12  ;;  %v383_v22 = vadd.f32 %v381_v61, %v373_v14  ;;  %v396_v56 = vmul.f32 %v394_v60, %v1705_v30  ;;  %v495_v40 = vstv %s1730_s6  ;;  %v434_v7 = vpop.permute.xlu0 %433  ;;  %s2088_s6 = sld [smem:[#allocation3 + $0xd]] }
 0x104   : > { %v412_v57 = vsel %vm339_vm6, %v410_v8, %v411_v16  ;;  %v435_v52 = vrot.slane %v1769_v1, 5  ;;  %v436_v44 = vrot.slane %v1771_v27, 5  ;;  %v505_v46 = vstv %s1737_s7  ;;  %s1904_s7 = sld [smem:[#allocation3 + $0x13]] }
 0x105   : > { %v393_v3 = vadd.f32 %v391_v23, %v383_v22  ;;  %v407_v39 = vadd.f32 %v405_v24, %v397_v21  ;;  %v406_v47 = vmul.f32 %v404_v4, %v402_v34  ;;  %v415_v58 = vmul.f32 %v414_v5, %v413_v35 }
 0x106   : > { %v515_v60 = vstv %s1744_s8  ;;  %v422_v30 = vsel %vm350_vm7, %v420_v36, %v421_v33  ;;  %v423_v59 = vsel %vm350_vm7, %v419_v17, %v420_v36  ;;  %v445_v62 = vrot.slane %v1769_v1, 6  ;;  %s1921_s8 = sld [smem:[#allocation3 + $0x28]] }
 0x107   : > { %v398_v54 = vadd.f32 %v396_v56, %v393_v3  ;;  %v446_v0 = vrot.slane %v1771_v27, 6  ;;  %v416_v6 = vmul.f32 %v414_v5, %v412_v57  ;;  %v417_v4 = vadd.f32 %v415_v58, %v407_v39 }
 0x108   : > { %v525_v55 = vstv %s1757_s12  ;;  %v455_v11 = vrot.slane %v1769_v1, 7  ;;  %v438_v13 = vsel %vm290_vm3, %v435_v52, %v436_v44  ;;  %v456_v53 = vrot.slane %v1771_v27, 7  ;;  %s1936_s12 = sld [smem:[#allocation3 + $0x6]] }
 0x109   : > { %v408_v2 = vadd.f32 %v406_v47, %v398_v54  ;;  %v535_v49 = vstv %s1761_s21  ;;  %v425_v8 = vmul.f32 %v424_v9, %v423_v59  ;;  %v426_v51 = vmul.f32 %v424_v9, %v422_v30  ;;  %s2097_s21 = sld [smem:[#allocation3 + $0x14]] }
 0x10a   : > { %v1814_v5 = vmul.f32 %v535_v49, %v1533_v18  ;;  %v448_v12 = vsel %vm301_vm4, %v445_v62, %v446_v0  ;;  %v437_v14 = vrot.slane %v434_v7, 5  ;;  %v447_v61 = vrot.slane %v434_v7, 6 }
 0x10b   : > { %v418_v50 = vadd.f32 %v416_v6, %v408_v2  ;;  %v457_v17 = vrot.slane %v434_v7, 7  ;;  %v442_v21 = vmul.f32 %v440_v31, %v438_v13  ;;  %v427_v22 = vadd.f32 %v425_v8, %v417_v4 }
 0x10c   : > { %v1821_v23 = vmul.f32 %v505_v46, %v1546_v26  ;;  %v458_v9 = vsel %vm312_vm5, %v455_v11, %v456_v53  ;;  %v439_v18 = vsel %vm290_vm3, %v437_v14, %v435_v52  ;;  %v449_v24 = vsel %vm301_vm4, %v447_v61, %v445_v62  ;;  %v1900_v14 = vpop.permute.xlu1 %560 }
 0x10d   : > { %v428_v16 = vadd.f32 %v426_v51, %v418_v50  ;;  %v472_v33 = vrot.slane %v434_v7, 1  ;;  %v452_v35 = vmul.f32 %v450_v63, %v448_v12  ;;  %v441_v36 = vmul.f32 %v440_v31, %v439_v18 }
 0x10e   : > { %v1834_v3 = vmul.f32 %v505_v46, %v1542_v25  ;;  %v470_v26 = vrot.slane %v1769_v1, 1  ;;  %v471_v56 = vrot.slane %v1771_v27, 1  ;;  %v459_v39 = vsel %vm312_vm5, %v457_v17, %v455_v11 }
 0x10f   : > { %v444_v34 = vadd.f32 %v442_v21, %v428_v16  ;;  %v482_v57 = vrot.slane %v434_v7, 2  ;;  %v462_v44 = vmul.f32 %v460_v48, %v458_v9  ;;  %v443_v54 = vadd.f32 %v441_v36, %v427_v22 }
 0x110   : > { %v451_v31 = vmul.f32 %v450_v63, %v449_v24  ;;  %v480_v25 = vrot.slane %v1769_v1, 2  ;;  %v481_v46 = vrot.slane %v1771_v27, 2  ;;  %v473_v47 = vsel %vm328_vm2, %v471_v56, %v472_v33 }
 0x111   : > { %v454_v52 = vadd.f32 %v452_v35, %v444_v34  ;;  %v492_v58 = vrot.slane %v434_v7, 3  ;;  %v467_v59 = vmul.f32 %v465_v10, %v1771_v27  ;;  %v461_v63 = vmul.f32 %v460_v48, %v459_v39 }
 0x112   : > { %v453_v62 = vadd.f32 %v451_v31, %v443_v54  ;;  %v490_v0 = vrot.slane %v1769_v1, 3  ;;  %v474_v2 = vsel %vm328_vm2, %v470_v26, %v471_v56  ;;  %v491_v6 = vrot.slane %v1771_v27, 3  ;;  %v1947_v56 = vpop.permute.xlu0 %562 }
 0x113   : > { %v464_v30 = vadd.f32 %v462_v44, %v454_v52  ;;  %v483_v4 = vsel %vm339_vm6, %v481_v46, %v482_v57  ;;  %v466_v48 = vmul.f32 %v465_v10, %v1769_v1  ;;  %v477_v13 = vmul.f32 %v475_v19, %v473_v47 }
 0x114   : > { %v463_v11 = vadd.f32 %v461_v63, %v453_v62  ;;  %v484_v27 = vsel %vm339_vm6, %v480_v25, %v481_v46  ;;  %v493_v53 = vsel %vm350_vm7, %v491_v6, %v492_v58  ;;  %v516_v10 = vmul.f32 %v515_v60, %v1556_v29 }
 0x115   : > { %v469_v7 = vadd.f32 %v467_v59, %v464_v30  ;;  %v517_v1 = vmul.f32 %v515_v60, %v1552_v28  ;;  %v476_v50 = vmul.f32 %v475_v19, %v474_v2  ;;  %v487_v12 = vmul.f32 %v485_v20, %v483_v4 }
 0x116   : > { %v468_v8 = vadd.f32 %v466_v48, %v463_v11  ;;  %v494_v28 = vsel %vm350_vm7, %v490_v0, %v491_v6  ;;  %v527_v29 = vmul.f32 %v525_v55, %v1562_v32  ;;  %v545_v19 = vstv %s1840_s25  ;;  %s2105_s25 = sld [smem:[#allocation3 + $0x22]] }
 0x117   : > { %v479_v51 = vadd.f32 %v477_v13, %v469_v7  ;;  %v526_v60 = vmul.f32 %v525_v55, %v1569_v37  ;;  %v486_v61 = vmul.f32 %v485_v20, %v484_v27  ;;  %v497_v21 = vmul.f32 %v495_v40, %v493_v53 }
 0x118   : > { %v478_v17 = vadd.f32 %v476_v50, %v468_v8  ;;  %v596_v32 = vstv %s1846_s4  ;;  %v547_v22 = vmul.f32 %v545_v19, %v1574_v38  ;;  %v555_v9 = vstv %s1852_s24  ;;  %v1979_v50 = vpop.permute.xlu0 %631  ;;  %s2149_s4 = sld [smem:[#allocation3 + $0x30]] }
 0x119   : > { %v489_v16 = vadd.f32 %v487_v12, %v479_v51  ;;  %v536_v37 = vmul.f32 %v535_v49, %v1584_v42  ;;  %v496_v20 = vmul.f32 %v495_v40, %v494_v28  ;;  %v571_v24 = vstv %s1859_s28  ;;  %v1943_v40 = vpop.permute.xlu1 %564 }
 0x11a   : > { %v488_v55 = vadd.f32 %v486_v61, %v478_v17  ;;  %v557_v38 = vmul.f32 %v555_v9, %v1580_v41  ;;  %v581_v33 = vstv %s1861_s2  ;;  %v591_v34 = vstv %s1869_s23 }
 0x11b   : > { %v499_v18 = vadd.f32 %v497_v21, %v489_v16  ;;  %v546_v42 = vmul.f32 %v545_v19, %v1588_v43  ;;  %v556_v36 = vmul.f32 %v555_v9, %v1593_v45  ;;  %v606_v26 = vstv %s1871_s26 }
 0x11c   : > { %v498_v49 = vadd.f32 %v496_v20, %v488_v55  ;;  %v616_v41 = vstv %s1878_s30  ;;  %v626_v39 = vstv %s1880_s15  ;;  %v667_v57 = vstv %s1892_s20 }
 0x11d   : > { %v509_v35 = vadd.f32 %v1834_v3, %v499_v18  ;;  %v642_v52 = vstv %s1894_s22  ;;  %v652_v54 = vstv %s1902_s0  ;;  %v662_v3 = vstv %s1904_s7 }
 0x11e   : > { %v508_v43 = vadd.f32 %v1821_v23, %v498_v49  ;;  %v566_v31 = vrot.slane %v1900_v14, 5  ;;  %v568_v45 = vrot.slane %v1943_v40, 5  ;;  %v567_v25 = vrot.slane %v1947_v56, 5 }
 0x11f   : > { %v519_v44 = vadd.f32 %v517_v1, %v509_v35  ;;  %v677_v46 = vstv %s1915_s17  ;;  %v687_v30 = vstv %s1921_s8  ;;  %v697_v59 = vstv %s1923_s27  ;;  %s2140_s27 = sld [smem:[#allocation3 + $0x29]] }
 0x120   : > { %v518_v47 = vadd.f32 %v516_v10, %v508_v43  ;;  %v576_v62 = vrot.slane %v1900_v14, 6  ;;  %v578_v23 = vrot.slane %v1943_v40, 6  ;;  %v577_v63 = vrot.slane %v1947_v56, 6 }
 0x121   : > { %v529_v58 = vadd.f32 %v527_v29, %v519_v44  ;;  %v738_v0 = vstv %s1931_s3  ;;  %v586_v6 = vrot.slane %v1900_v14, 7  ;;  %v713_v48 = vstv %s1936_s12  ;;  %v2002_v44 = vpop.permute.xlu1 %633 }
 0x122   : > { %v528_v4 = vadd.f32 %v526_v60, %v518_v47  ;;  %v597_v7 = vmul.f32 %v596_v32, %v1900_v14  ;;  %v570_v11 = vsel %vm290_vm3, %v568_v45, %v566_v31  ;;  %v569_v13 = vsel %vm290_vm3, %v566_v31, %v567_v25 }
 0x123   : > { %v539_v2 = vadd.f32 %v1814_v5, %v529_v58  ;;  %v587_v27 = vrot.slane %v1947_v56, 7  ;;  %v601_v53 = vrot.slane %v1900_v14, 1  ;;  %v588_v5 = vrot.slane %v1943_v40, 7 }
 0x124   : > { %v538_v10 = vadd.f32 %v536_v37, %v528_v4  ;;  %v580_v8 = vsel %vm301_vm4, %v578_v23, %v576_v62  ;;  %v603_v51 = vrot.slane %v1943_v40, 1  ;;  %v579_v12 = vsel %vm301_vm4, %v576_v62, %v577_v63 }
 0x125   : > { %v549_v1 = vadd.f32 %v547_v22, %v539_v2  ;;  %v602_v28 = vrot.slane %v1947_v56, 1  ;;  %v572_v19 = vmul.f32 %v571_v24, %v570_v11  ;;  %v573_v61 = vmul.f32 %v571_v24, %v569_v13 }
 0x126   : > { %v548_v29 = vadd.f32 %v546_v42, %v538_v10  ;;  %v611_v17 = vrot.slane %v1900_v14, 2  ;;  %v613_v16 = vrot.slane %v1943_v40, 2  ;;  %v589_v21 = vsel %vm312_vm5, %v586_v6, %v587_v27 }
 0x127   : > { %v559_v60 = vadd.f32 %v557_v38, %v549_v1  ;;  %v612_v22 = vrot.slane %v1947_v56, 2  ;;  %v590_v37 = vsel %vm312_vm5, %v588_v5, %v586_v6  ;;  %v583_v55 = vmul.f32 %v581_v33, %v579_v12 }
 0x128   : > { %v558_v9 = vadd.f32 %v556_v36, %v548_v29  ;;  %v621_v18 = vrot.slane %v1900_v14, 3  ;;  %v582_v24 = vmul.f32 %v581_v33, %v580_v8  ;;  %v623_v38 = vrot.slane %v1943_v40, 3  ;;  %v2004_v14 = vpop.permute.xlu0 %635 }
 0x129   : > { %v575_v20 = vadd.f32 %v573_v61, %v559_v60  ;;  %v605_v42 = vsel %vm328_vm2, %v601_v53, %v602_v28  ;;  %v593_v36 = vmul.f32 %v591_v34, %v589_v21  ;;  %v604_v43 = vsel %vm328_vm2, %v602_v28, %v603_v51  ;;  %v2047_v60 = vpop.permute.xlu1 %702 }
 0x12a   : > { %v574_v49 = vadd.f32 %v572_v19, %v558_v9  ;;  %v592_v33 = vmul.f32 %v591_v34, %v590_v37  ;;  %v614_v40 = vsel %vm339_vm6, %v612_v22, %v613_v16  ;;  %v615_v31 = vsel %vm339_vm6, %v611_v17, %v612_v22 }
 0x12b   : > { %v585_v35 = vadd.f32 %v583_v55, %v575_v20  ;;  %v622_v45 = vrot.slane %v1947_v56, 3  ;;  %v598_v58 = vmul.f32 %v596_v32, %v1947_v56  ;;  %v607_v62 = vmul.f32 %v606_v26, %v605_v42 }
 0x12c   : > { %v584_v25 = vadd.f32 %v582_v24, %v574_v49  ;;  %v608_v23 = vmul.f32 %v606_v26, %v604_v43  ;;  %v637_v34 = vrot.slane %v1979_v50, 5  ;;  %v638_v63 = vrot.slane %v2002_v44, 5 }
 0x12d   : > { %v595_v47 = vadd.f32 %v593_v36, %v585_v35  ;;  %v639_v2 = vrot.slane %v2004_v14, 5  ;;  %v617_v11 = vmul.f32 %v616_v41, %v615_v31  ;;  %v618_v13 = vmul.f32 %v616_v41, %v614_v40 }
 0x12e   : > { %v594_v6 = vadd.f32 %v592_v33, %v584_v25  ;;  %v624_v32 = vsel %vm350_vm7, %v622_v45, %v623_v38  ;;  %v625_v26 = vsel %vm350_vm7, %v621_v18, %v622_v45  ;;  %v647_v56 = vrot.slane %v1979_v50, 6 }
 0x12f   : > { %v600_v4 = vadd.f32 %v598_v58, %v595_v47  ;;  %v648_v27 = vrot.slane %v2002_v44, 6  ;;  %v657_v5 = vrot.slane %v1979_v50, 7  ;;  %v668_v1 = vmul.f32 %v667_v57, %v1979_v50  ;;  %v2078_v47 = vpop.permute.xlu1 %706  ;;  %v2080_v58 = vpop.permute.xlu0 %704 }
 0x130   : > { %v599_v53 = vadd.f32 %v597_v7, %v594_v6  ;;  %v640_v41 = vsel %vm290_vm3, %v637_v34, %v638_v63  ;;  %v658_v8 = vrot.slane %v2002_v44, 7  ;;  %v641_v51 = vsel %vm290_vm3, %v639_v2, %v637_v34 }
 0x131   : > { %v610_v10 = vadd.f32 %v608_v23, %v600_v4  ;;  %v649_v12 = vrot.slane %v2004_v14, 6  ;;  %v627_v29 = vmul.f32 %v626_v39, %v625_v26  ;;  %v628_v19 = vmul.f32 %v626_v39, %v624_v32 }
 0x132   : > { %v609_v28 = vadd.f32 %v607_v62, %v599_v53  ;;  %v672_v61 = vrot.slane %v1979_v50, 1  ;;  %v682_v17 = vrot.slane %v1979_v50, 2  ;;  %v650_v16 = vsel %vm301_vm4, %v647_v56, %v648_v27 }
 0x133   : > { %v620_v7 = vadd.f32 %v618_v13, %v610_v10  ;;  %v659_v21 = vrot.slane %v2004_v14, 7  ;;  %v644_v37 = vmul.f32 %v642_v52, %v640_v41  ;;  %v643_v20 = vmul.f32 %v642_v52, %v641_v51 }
 0x134   : > { %v619_v22 = vadd.f32 %v617_v11, %v609_v28  ;;  %v660_v39 = vsel %vm312_vm5, %v657_v5, %v658_v8  ;;  %v673_v55 = vrot.slane %v2002_v44, 1  ;;  %v651_v18 = vsel %vm301_vm4, %v649_v12, %v647_v56 }
 0x135   : > { %v630_v9 = vadd.f32 %v628_v19, %v620_v7  ;;  %v674_v24 = vrot.slane %v2004_v14, 1  ;;  %v654_v42 = vmul.f32 %v652_v54, %v650_v16  ;;  %v683_v49 = vrot.slane %v2002_v44, 2 }
 0x136   : > { %v629_v35 = vadd.f32 %v627_v29, %v619_v22  ;;  %v692_v36 = vrot.slane %v1979_v50, 3  ;;  %v669_v52 = vmul.f32 %v667_v57, %v2002_v44  ;;  %v661_v43 = vsel %vm312_vm5, %v659_v21, %v657_v5 }
 0x137   : > { %v646_v38 = vadd.f32 %v644_v37, %v630_v9  ;;  %v684_v33 = vrot.slane %v2004_v14, 2  ;;  %v664_v31 = vmul.f32 %v662_v3, %v660_v39  ;;  %v653_v25 = vmul.f32 %v652_v54, %v651_v18 }
 0x138   : > { %v645_v45 = vadd.f32 %v643_v20, %v629_v35  ;;  %v676_v57 = vsel %vm328_vm2, %v672_v61, %v673_v55  ;;  %v693_v50 = vrot.slane %v2002_v44, 3  ;;  %v675_v62 = vsel %vm328_vm2, %v673_v55, %v674_v24 }
 0x139   : > { %v656_v40 = vadd.f32 %v654_v42, %v646_v38  ;;  %v694_v23 = vrot.slane %v2004_v14, 3  ;;  %v686_v54 = vsel %vm339_vm6, %v682_v17, %v683_v49  ;;  %v663_v2 = vmul.f32 %v662_v3, %v661_v43 }
 0x13a   : > { %v655_v63 = vadd.f32 %v653_v25, %v645_v45  ;;  %v685_v6 = vsel %vm339_vm6, %v683_v49, %v684_v33  ;;  %v708_v44 = vrot.slane %v2047_v60, 5  ;;  %v710_v4 = vrot.slane %v2078_v47, 5 }
 0x13b   : > { %v666_v34 = vadd.f32 %v664_v31, %v656_v40  ;;  %v709_v14 = vrot.slane %v2080_v58, 5  ;;  %v678_v13 = vmul.f32 %v677_v46, %v676_v57  ;;  %v679_v26 = vmul.f32 %v677_v46, %v675_v62 }
 0x13c   : > { %v665_v32 = vadd.f32 %v663_v2, %v655_v63  ;;  %v696_v3 = vsel %vm350_vm7, %v692_v36, %v693_v50  ;;  %v695_v56 = vsel %vm350_vm7, %v693_v50, %v694_v23  ;;  %v718_v27 = vrot.slane %v2047_v60, 6 }
 0x13d   : > { %v671_v11 = vadd.f32 %v669_v52, %v666_v34  ;;  %v719_v53 = vrot.slane %v2080_v58, 6  ;;  %v689_v41 = vmul.f32 %v687_v30, %v685_v6  ;;  %v728_v46 = vrot.slane %v2047_v60, 7 }
 0x13e   : > { %v670_v10 = vadd.f32 %v668_v1, %v665_v32  ;;  %v712_v8 = vsel %vm290_vm3, %v710_v4, %v708_v44  ;;  %v720_v51 = vrot.slane %v2078_v47, 6  ;;  %v711_v12 = vsel %vm290_vm3, %v708_v44, %v709_v14 }
 0x13f   : > { %v681_v5 = vadd.f32 %v679_v26, %v671_v11  ;;  %v729_v28 = vrot.slane %v2080_v58, 7  ;;  %v688_v1 = vmul.f32 %v687_v30, %v686_v54  ;;  %v699_v19 = vmul.f32 %v697_v59, %v695_v56 }
 0x140   : > { %v680_v7 = vadd.f32 %v678_v13, %v670_v10  ;;  %v698_v61 = vmul.f32 %v697_v59, %v696_v3  ;;  %v723_v17 = vstv %s2088_s6  ;;  %v730_v16 = vrot.slane %v2078_v47, 7 }
 0x141   : > { %v691_v29 = vadd.f32 %v689_v41, %v681_v5  ;;  %v721_v21 = vsel %vm301_vm4, %v718_v27, %v719_v53  ;;  %v714_v37 = vmul.f32 %v713_v48, %v712_v8  ;;  %v715_v20 = vmul.f32 %v713_v48, %v711_v12 }
 0x142   : > { %v690_v9 = vadd.f32 %v688_v1, %v680_v7  ;;  %v733_v30 = vstv %s2097_s21  ;;  %v722_v39 = vsel %vm301_vm4, %v720_v51, %v718_v27  ;;  %v745_v55 = vrot.slane %v2078_v47, 1 }
 0x143   : > { %v701_v22 = vadd.f32 %v699_v19, %v691_v29  ;;  %v731_v59 = vsel %vm312_vm5, %v728_v46, %v729_v28  ;;  %v748_v24 = vstv %s2105_s25  ;;  %v725_v42 = vmul.f32 %v723_v17, %v721_v21 }
 0x144   : > { %v700_v18 = vadd.f32 %v698_v61, %v690_v9  ;;  %v743_v49 = vrot.slane %v2047_v60, 1  ;;  %v732_v48 = vsel %vm312_vm5, %v730_v16, %v728_v46  ;;  %v755_v35 = vrot.slane %v2078_v47, 2 }
 0x145   : > { %v717_v38 = vadd.f32 %v715_v20, %v701_v22  ;;  %v744_v36 = vrot.slane %v2080_v58, 1  ;;  %v724_v43 = vmul.f32 %v723_v17, %v722_v39  ;;  %v735_v40 = vmul.f32 %v733_v30, %v731_v59 }
 0x146   : > { %v716_v52 = vadd.f32 %v714_v37, %v700_v18  ;;  %v753_v31 = vrot.slane %v2047_v60, 2  ;;  %v765_v45 = vrot.slane %v2078_v47, 3  ;;  %v754_v57 = vrot.slane %v2080_v58, 2 }
 0x147   : > { %v727_v33 = vadd.f32 %v725_v42, %v717_v38  ;;  %v746_v25 = vsel %vm328_vm2, %v744_v36, %v745_v55  ;;  %v734_v62 = vmul.f32 %v733_v30, %v732_v48  ;;  %v740_v34 = vmul.f32 %v738_v0, %v2080_v58 }
 0x148   : > { %v726_v50 = vadd.f32 %v724_v43, %v716_v52  ;;  %v763_v54 = vrot.slane %v2047_v60, 3  ;;  %v747_v63 = vsel %vm328_vm2, %v743_v49, %v744_v36  ;;  %v756_v47 = vsel %vm339_vm6, %v754_v57, %v755_v35 }
 0x149   : > { %v737_v23 = vadd.f32 %v735_v40, %v727_v33  ;;  %v764_v2 = vrot.slane %v2080_v58, 3  ;;  %v739_v44 = vmul.f32 %v738_v0, %v2047_v60  ;;  %v750_v14 = vmul.f32 %v748_v24, %v746_v25 }
 0x14a   : > { %v736_v6 = vadd.f32 %v734_v62, %v726_v50  ;;  %v758_v11 = vstv %s2140_s27  ;;  %v757_v13 = vsel %vm339_vm6, %v753_v31, %v754_v57  ;;  %v749_v3 = vmul.f32 %v748_v24, %v747_v63 }
 0x14b   : > { %v742_v4 = vadd.f32 %v740_v34, %v737_v23  ;;  %v766_v32 = vsel %vm350_vm7, %v764_v2, %v765_v45  ;;  %v760_v27 = vmul.f32 %v758_v11, %v756_v47  ;;  %v768_v53 = vstv %s2149_s4 }
 0x14c   : > { %v741_v26 = vadd.f32 %v739_v44, %v736_v6  ;;  %v767_v58 = vsel %vm350_vm7, %v763_v54, %v764_v2  ;;  %v759_v5 = vmul.f32 %v758_v11, %v757_v13  ;;  %v770_v60 = vmul.f32 %v768_v53, %v766_v32 }
 0x14d   : > { %v752_v56 = vadd.f32 %v750_v14, %v742_v4  ;;  %v769_v46 = vmul.f32 %v768_v53, %v767_v58 }
 0x14e   : > { %v751_v10 = vadd.f32 %v749_v3, %v741_v26 }
 0x14f   : > { %v762_v0 = vadd.f32 %v760_v27, %v752_v56 }
 0x150   : > { %v761_v41 = vadd.f32 %v759_v5, %v751_v10 }
 0x151   : > { %v772_v8 = vadd.f32 %v770_v60, %v762_v0 }
 0x152   : > { %v771_v51 = vadd.f32 %v769_v46, %v761_v41 }
 0x153   : > { %v969_v12 = vmul.f32 -1.442695, %v772_v8 }
 0x154   : > { %v968_v28 = vmul.f32 -1.442695, %v771_v51 }
 0x155   : > { %1101 = vpow2.f32 %v969_v12 }
 0x156   : > { %1103 = vpow2.f32 %v968_v28 }
 0x15f   : > { %v1102_v1 = vpop.eup %1101 }
 0x160   : > { %v780_v7 = vadd.f32 1.0, %v1102_v1  ;;  %v1104_v29 = vpop.eup %1103 }
 0x161   : > { %v779_v19 = vadd.f32 1.0, %v1104_v29 }
 0x162   : > { %1105 = vrcp.f32 %v780_v7 }
 0x163   : > { %1107 = vrcp.f32 %v779_v19 }
 0x16c   : > { %v1106_v15 = vpop.eup %1105 }
 0x16d   : > { %787 = vst.msk [vmem:[%s1506_s29 + $0x8] sm:$0xff] %vm785_vm8, %v1106_v15  ;;  %v1108_v61 = vpop.eup %1107 }
 0x16e   : > { %786 = vst.msk [vmem:[%s1506_s29] sm:$0xff] %vm785_vm8, %v1108_v61 }
 0x16f PF: > { %s2289_s24 = sld [smem:[#allocation15_spill]]  ;;  %s976_s28 = sshll.u32 %s1266_s16, 8 }
 0x170   : > { %s2290_s26 = sld [smem:[#allocation19_spill]]  ;;  %s802_s15 = sshll.u32 %s1506_s29, 4  ;;  %s2186_s15 = int_to_ptr.vmem [resolvable:$true] %s802_s15 }
 0x171   : > { %s2291_s20 = sand.u32 1, %s1242_s10   ;;  %s1152_s0 = scalar_lea.vmem %s2186_s15, 256 }
 0x172   : > { %s2190_s22 = scalar_lea.sflag [#allocation5], %s2291_s20  ;;  %p1153_p9 = scmp.ne.s32.totalorder %s2186_s15, %s1152_s0 }
 0x173   : > { %s1291_s16 = smov [#allocation8]  }
 0x174   : > { %s1156_s7 = sshll.u32 %s1291_s16, 4  ;;  %s1157_s7 = int_to_ptr.vmem [resolvable:$false] %s1156_s7 }
 0x175   : > { %p2292_p11 = scmp.ne.s32.totalorder %s2289_s24, 0  ;;  %s1158_s17 = scalar_lea.vmem %s1157_s7, 512 }
 0x176   : > { %s2183_s30 = scalar_lea.hbm %s2290_s26, %s976_s28  ;;  %p1159_p7 = scmp.lt.s32.totalorder %s2186_s15, %s1157_s7 }
 0x177   : > { %p1154_p5 = pnand %p1153_p9, %p2292_p11  ;;  %p1160_p4 = scmp.lt.s32.totalorder %s1158_s17, %s1152_s0 }
 0x179   : > { %p1155_p8 = pneg %p1154_p5  ;;  %p1161_p13 = por %p1160_p4, %p1159_p7 }
 0x17b   : > { %p1162_p1 = pnand %p1161_p13, %p1155_p8 }
 0x17d   : > { %1165 = shalt.err (!%p1162_p1)
}
 0x17e   : > { %s1166_s29 = scalar_lea.hbm %s2183_s30, 256  ;;  %s1170_s12 = scalar_lea.hbm %s2290_s26, 512 }
 0x17f   : > { %p1167_p2 = scmp.ne.s32.totalorder %s2183_s30, %s1166_s29  ;;  %p1171_p6 = scmp.lt.u32.totalorder %s2183_s30, %s2290_s26 }
 0x180   : > { %p1172_p10 = scmp.lt.u32.totalorder %s1170_s12, %s1166_s29  ;;  %p1174_p9 = scmp.lt.u32.totalorder %s1166_s29, %s2183_s30 }
 0x181   : > { %p1168_p12 = pnand %p1167_p2, %p2292_p11 }
 0x182   : > { %p1173_p0 = por %p1172_p10, %p1171_p6 }
 0x183   : > { %p1169_p3 = pneg %p1168_p12 }
 0x184   : > { %p1175_p5 = por %p1174_p9, %p1173_p0 }
 0x186   : > { %p1176_p8 = pnand %p1175_p5, %p1169_p3 }
 0x188   : > { %1179 = shalt.err (!%p1176_p8)
}
 0x189   : > { %s1292_s25 = smov 128   ;;  %s1293_s27 = smov 8  }
 0x18a   : > { %983 = dma.vmem_to_hbm [thread:$0]  (%p2292_p11), %s2186_s15, 256, %s2183_s30, %s2190_s22, %s1292_s25, %s1292_s25, %s1293_s27  }
 0x18b PF: > { %s2293_s4 = sld [smem:[#allocation14_spill]]  ;;  %s2294_s28 = sld [smem:[#allocation12_spill]] }
 0x18c   : > { %s2295_s2 = sld [smem:[#allocation16_spill]] }
 0x191   : > { %p1000_p7 = scmp.ge.s32.totalorder %s2293_s4, 2  ;;  %s817_s23 = sand.u32 1, %s2294_s28  }
 0x192   : > { %p2296_p4 = scmp.ne.s32.totalorder %s2295_s2, 0  ;;  %s818_s20 = scalar_lea.sflag [#allocation5], %s817_s23 }
 0x194   : > { %p994_p13 = pnand %p1000_p7, %p2296_p4 }
 0x196   : > { %1233 = dma.done.wait (!%p994_p13), %s818_s20, 256  }
 0x197   : > { %1235 = vsyncadd (!%p994_p13), %s818_s20, 4294967040  ;;  %s19_s0 = sadd.s32 1, %s2293_s4   ;;  %s2297_s16 = smov %s1450_s9 }
 0x198   : > { %p16_p1 = scmp.ge.s32.totalorder %s19_s0, 6   ;;  %s2298_s15 = sld [smem:[#allocation13_spill]] }
 0x199   : > { %s2299_s17 = sld [smem:[#allocation17_spill]]  ;;  %s2300_s9 = smov %s1242_s10 }
 0x19a   : > { %s2301_s10 = smov %s1246_s11  ;;  %s2302_s11 = smov %s2297_s16 }
 0x19b   : > { %s2303_s12 = smov %s1254_s13  ;;  %s2304_s13 = smov %s1258_s14 }
 0x19c   : > { %s2305_s14 = smov %s1455_s19  ;;  %s2306_s16 = smov %s1274_s18 }
 0x19d   : > { %s2307_s18 = smov %s2314_s5  ;;  %s2308_s19 = smov %s19_s0 }
 0x19e   :  { %18 = sbr.rel (!%p16_p1) target bundleno = 13 (0xd), region = 91 }
 0x1a5   :  { %823 = vsyncpa [#allocation4], 1 }
 0x1a6   :  { %825 = vsyncpa [#allocation4 + $0x1], 1 }
 0x1a7   :  { %826 = vsyncpa [#allocation5], 1 }
 0x1a8   :  { %828 = vsyncpa [#allocation5 + $0x1], 1 }
 0x1a9   :  { %829 = vsyncpa [#allocation6], 1 }
 0x1aa   :  { %831 = vsyncpa [#allocation6 + $0x1], 1 }

</bundles_post_ra>
